<compile_context>
chip_gen: v6e
topology: v6e:2x2x1
jax: 0.10.0
libtpu: 0.0.40
codegen_flags: <defaults>
</compile_context>

<pallas_src>
import jax
import jax.numpy as jnp
from jax.experimental import pallas as pl
from jax.experimental.pallas import tpu as pltpu

CPAD = 128            # lane width every hidden layer is padded to
KSIZE = 5             # Conv1d kernel size
WEIGHT_DTYPE = jnp.bfloat16


# ----------------------------------------------------------------------------
# Fused kernel
# ----------------------------------------------------------------------------
def _conv_bn_relu_pool(read_window, w_ref, scale_ref, shift_ref, b, t, cin):
    """Conv1d(k=5,'same') + BatchNorm + ReLU + MaxPool1d(2,2), batch folded into M.

    read_window(k) -> (b, t, cin) view of rows [k, k+t) of the zero-padded input.
    w_ref: 2D (KSIZE*cin, cout) im2col weights, or 3D (KSIZE, cin, cout) tap-major.
    Returns the pooled activation (b, t//2, cout) in f32.
    """
    cout = w_ref.shape[-1]
    wdt = w_ref.dtype
    if w_ref.ndim == 2:
        # im2col: lane-aligned concat of the 5 taps -> one MXU contraction, K = 5*cin.
        cols = jnp.concatenate([read_window(k) for k in range(KSIZE)], axis=-1)
        acc = jnp.dot(cols.reshape(b * t, KSIZE * cin).astype(wdt), w_ref[...],
                      preferred_element_type=jnp.float32)
    else:
        # Narrow input channels (first layer): tap-wise matmuls, still batched in M.
        acc = jnp.zeros((b * t, cout), jnp.float32)
        for k in range(KSIZE):
            acc = acc + jnp.dot(read_window(k).reshape(b * t, cin).astype(wdt),
                                w_ref[k], preferred_element_type=jnp.float32)
    act = jnp.maximum(acc * scale_ref[...] + shift_ref[...], 0.0)   # fused BN + ReLU
    pooled = jnp.max(act.reshape((b * t) // 2, 2, cout), axis=1)    # MaxPool(2, 2)
    return pooled.reshape(b, t // 2, cout)


def tstr_fused_kernel(x_ref,
                      w1_ref, s1_ref, h1_ref,
                      w2_ref, s2_ref, h2_ref,
                      w3_ref, s3_ref, h3_ref,
                      w4_ref, s4_ref, h4_ref,
                      fcs_w_ref, fcs_b_ref, fcc_w_ref, fcc_b_ref,
                      o_ref, buf_ref):
    b, t_pad, cin = x_ref.shape
    t = t_pad - 4

    # conv block 1: windows come straight from the (time-halo-padded) input block.
    a = _conv_bn_relu_pool(lambda k: x_ref[:, k:k + t, :],
                           w1_ref, s1_ref, h1_ref, b, t, cin)

    # Zero the left halo rows of the VMEM staging buffer once.
    buf_ref[:, 0:2, :] = jnp.zeros((b, 2, CPAD), jnp.float32)

    # conv blocks 2..4: stage the activation in VMEM with a zero halo so the
    # k=5 'same' padding never touches HBM.
    for (w_ref, s_ref, h_ref) in ((w2_ref, s2_ref, h2_ref),
                                  (w3_ref, s3_ref, h3_ref),
                                  (w4_ref, s4_ref, h4_ref)):
        t_cur = a.shape[1]
        buf_ref[:, 2:2 + t_cur, :] = a
        buf_ref[:, 2 + t_cur:4 + t_cur, :] = jnp.zeros((b, 2, CPAD), jnp.float32)
        a = _conv_bn_relu_pool(lambda k, tc=t_cur: buf_ref[:, k:k + tc, :],
                               w_ref, s_ref, h_ref, b, t_cur, CPAD)

    # fc_shared: PyTorch's channel-major flatten is folded into the weight layout,
    # so it reduces to a sum of (b, 128) @ (128, 128) matmuls over the T' slots.
    t_final = a.shape[1]
    acc = jnp.zeros((b, CPAD), jnp.float32)
    for tt in range(t_final):
        acc = acc + jnp.dot(a[:, tt, :].astype(fcs_w_ref.dtype), fcs_w_ref[tt],
                            preferred_element_type=jnp.float32)
    hid = jnp.maximum(acc + fcs_b_ref[...], 0.0)
    # Dropout(p=0.25) is the identity in eval mode.

    logits = jnp.dot(hid.astype(fcc_w_ref.dtype), fcc_w_ref[...],
                     preferred_element_type=jnp.float32) + fcc_b_ref[...]
    o_ref[...] = logits.astype(o_ref.dtype)


# ----------------------------------------------------------------------------
# Parameter prep (BN folding, im2col flattening, lane padding, bf16 cast)
# ----------------------------------------------------------------------------
def _prep_conv_block(w, bias, gamma, beta, mean, var, cin_pad, eps=1e-5):
    """Fold eval-mode BatchNorm1d into (scale, shift), lay out weights for the
    kernel, and zero-pad channels so every hidden lane width is CPAD."""
    k, cin, cout = w.shape
    inv_std = gamma / jnp.sqrt(var + eps)
    scale = inv_std
    shift = (bias - mean) * inv_std + beta
    w_p = jnp.zeros((k, cin_pad, CPAD), jnp.float32).at[:, :cin, :cout].set(w)
    if cin_pad % 128 == 0:
        w_out = w_p.reshape(k * cin_pad, CPAD)        # im2col layout (row = k*cin + c)
    else:
        w_out = w_p                                   # tap-major 3D for the tap path
    scale_p = jnp.zeros((1, CPAD), jnp.float32).at[0, :cout].set(scale)
    shift_p = jnp.zeros((1, CPAD), jnp.float32).at[0, :cout].set(shift)
    return w_out.astype(WEIGHT_DTYPE), scale_p, shift_p


def _prep_fc_shared(w, bias, t_final):
    """w rows are in PyTorch channel-major feature order f = c*T' + t'.
    Re-layout to (T', C, H) so the kernel needs no flatten/transpose; pad H->CPAD."""
    feat_dim, hdim = w.shape
    assert feat_dim == CPAD * t_final
    w_r = w.reshape(CPAD, t_final, hdim).transpose(1, 0, 2)       # (T', 128, 100)
    w_p = jnp.zeros((t_final, CPAD, CPAD), jnp.float32).at[:, :, :hdim].set(w_r)
    b_p = jnp.zeros((1, CPAD), jnp.float32).at[0, :hdim].set(bias)
    return w_p.astype(WEIGHT_DTYPE), b_p


def _prep_fc_class(w, bias):
    hdim, ncls = w.shape
    w_p = jnp.zeros((CPAD, CPAD), jnp.float32).at[:hdim, :ncls].set(w)
    b_p = jnp.zeros((1, CPAD), jnp.float32).at[0, :ncls].set(bias)
    return w_p.astype(WEIGHT_DTYPE), b_p


def prepare_params(params, num_timesteps):
    prep = []
    for idx, (w, b, gamma, beta, mean, var) in enumerate(params["conv_blocks"]):
        cin = w.shape[1]
        cin_pad = cin if idx == 0 else CPAD
        prep.extend(_prep_conv_block(w, b, gamma, beta, mean, var, cin_pad))
    t_final = num_timesteps // 16
    prep.extend(_prep_fc_shared(params["fc_shared_w"], params["fc_shared_b"], t_final))
    prep.extend(_prep_fc_class(params["fc_class_w"], params["fc_class_b"]))
    return prep


def _resident_spec(arr):
    zeros = (0,) * arr.ndim
    return pl.BlockSpec(arr.shape, lambda i: zeros)   # weights stay VMEM-resident


# ----------------------------------------------------------------------------
# Forward
# ----------------------------------------------------------------------------
def tstr_classifier_forward(x_nct, params, *, batch_block=8):
    """x_nct: (N, C, T) float32 (PyTorch layout) -> class logits (N, num_classes)."""
    n, c_in, t = x_nct.shape
    assert t % 16 == 0, "num_timesteps must be divisible by 16 (4x maxpool of 2)"
    num_classes = params["fc_class_w"].shape[1]

    prep = prepare_params(params, t)

    # NCT -> NTC (channels on lanes); single 'same' halo pad for the first conv.
    x = jnp.transpose(x_nct, (0, 2, 1))
    x = jnp.pad(x, ((0, 0), (2, 2), (0, 0)))

    # Batch blocking: one block if the batch is small, otherwise blocks of 8
    # (keeps the output block sublane-aligned) sharded across TensorCores.
    b_blk = n if n <= batch_block else batch_block
    n_blocks = pl.cdiv(n, b_blk)
    n_pad = n_blocks * b_blk
    if n_pad != n:
        x = jnp.pad(x, ((0, n_pad - n), (0, 0), (0, 0)))

    t_half = t // 2

    logits_padded = pl.pallas_call(
        tstr_fused_kernel,
        out_shape=jax.ShapeDtypeStruct((n_pad, CPAD), jnp.float32),
        grid_spec=pltpu.PrefetchScalarGridSpec(
            num_scalar_prefetch=0,
            grid=(n_blocks,),
            in_specs=[pl.BlockSpec((b_blk, t + 4, c_in), lambda i: (i, 0, 0))]
                     + [_resident_spec(arr) for arr in prep],
            out_specs=pl.BlockSpec((b_blk, CPAD), lambda i: (i, 0)),
            scratch_shapes=[pltpu.VMEM((b_blk, t_half + 4, CPAD), jnp.float32)],
        ),
        compiler_params=pltpu.CompilerParams(
            dimension_semantics=("parallel",),
            vmem_limit_bytes=32 * 1024 * 1024,
        ),
    )(x, *prep)

    return logits_padded[:n, :num_classes]


# ----------------------------------------------------------------------------
# Parameters (mirror the PyTorch module, eval mode)
# ----------------------------------------------------------------------------
def init_params(key, num_channels, num_timesteps, num_classes):
    """Conv weights are tap-major (5, Cin, Cout) (= PyTorch (Cout, Cin, 5) transposed);
    fc_shared_w rows are in PyTorch's channel-major flatten order f = c*T' + t'.
    BatchNorm uses synthetic running statistics (eval mode)."""
    chans = [num_channels, 16, 32, 64, 128]
    conv_blocks = []
    for i in range(4):
        key, kw, kb, kg, kbe, km, kv = jax.random.split(key, 7)
        c_in, c_out = chans[i], chans[i + 1]
        w = 0.1 * jax.random.normal(kw, (KSIZE, c_in, c_out), jnp.float32)
        b = 0.1 * jax.random.normal(kb, (c_out,), jnp.float32)
        gamma = 1.0 + 0.1 * jax.random.normal(kg, (c_out,), jnp.float32)
        beta = 0.1 * jax.random.normal(kbe, (c_out,), jnp.float32)
        mean = 0.05 * jax.random.normal(km, (c_out,), jnp.float32)
        var = 1.0 + 0.1 * jax.random.uniform(kv, (c_out,), jnp.float32)
        conv_blocks.append((w, b, gamma, beta, mean, var))

    feat_dim = num_timesteps * 8   # 128 channels * (T / 16), as in nn.Linear(T*8, 100)
    key, k1, k2, k3, k4 = jax.random.split(key, 5)
    return dict(
        conv_blocks=conv_blocks,
        fc_shared_w=0.05 * jax.random.normal(k1, (feat_dim, 100), jnp.float32),
        fc_shared_b=0.05 * jax.random.normal(k2, (100,), jnp.float32),
        fc_class_w=0.05 * jax.random.normal(k3, (100, num_classes), jnp.float32),
        fc_class_b=0.05 * jax.random.normal(k4, (num_classes,), jnp.float32),
    )


# ----------------------------------------------------------------------------
if __name__ == "__main__":
    N, C, T, NUM_CLASSES = 2, 3, 32, 5   # small shapes; T must be divisible by 16

    key = jax.random.PRNGKey(0)
    x_key, p_key = jax.random.split(key)
    x = jax.random.normal(x_key, (N, C, T), jnp.float32)
    params = init_params(p_key, num_channels=C, num_timesteps=T, num_classes=NUM_CLASSES)

    fwd = jax.jit(tstr_classifier_forward)
    logits = jax.block_until_ready(fwd(x, params))

    assert logits.shape == (N, NUM_CLASSES), logits.shape
    assert bool(jnp.all(jnp.isfinite(logits)))
    print("KERNEL_OK")
</pallas_src>

<mosaic_0001>
module attributes {stable_mosaic.version = 11 : i64} {
  func.func @tstr_fused_kernel(%arg0: i32, %arg1: memref<2x36x3xf32, #tpu.memory_space<vmem>>, %arg2: memref<5x3x128xbf16, #tpu.memory_space<vmem>>, %arg3: memref<1x128xf32, #tpu.memory_space<vmem>>, %arg4: memref<1x128xf32, #tpu.memory_space<vmem>>, %arg5: memref<640x128xbf16, #tpu.memory_space<vmem>>, %arg6: memref<1x128xf32, #tpu.memory_space<vmem>>, %arg7: memref<1x128xf32, #tpu.memory_space<vmem>>, %arg8: memref<640x128xbf16, #tpu.memory_space<vmem>>, %arg9: memref<1x128xf32, #tpu.memory_space<vmem>>, %arg10: memref<1x128xf32, #tpu.memory_space<vmem>>, %arg11: memref<640x128xbf16, #tpu.memory_space<vmem>>, %arg12: memref<1x128xf32, #tpu.memory_space<vmem>>, %arg13: memref<1x128xf32, #tpu.memory_space<vmem>>, %arg14: memref<2x128x128xbf16, #tpu.memory_space<vmem>>, %arg15: memref<1x128xf32, #tpu.memory_space<vmem>>, %arg16: memref<128x128xbf16, #tpu.memory_space<vmem>>, %arg17: memref<1x128xf32, #tpu.memory_space<vmem>>, %arg18: memref<2x128xf32, #tpu.memory_space<vmem>>, %arg19: memref<2x20x128xf32, #tpu.memory_space<vmem>>) attributes {dimension_semantics = [#tpu.dimension_semantics<parallel>], iteration_bounds = array<i64: 1>, scalar_prefetch = 0 : i64, scratch_operands = 1 : i64, tpu.core_type = #tpu.core_type<tc>, window_params = [{transform_indices = @transform_0, window_bounds = array<i64: 2, 36, 3>}, {pipeline_mode = #tpu.pipeline_mode<synchronous>, transform_indices = @transform_1, window_bounds = array<i64: 5, 3, 128>}, {pipeline_mode = #tpu.pipeline_mode<synchronous>, transform_indices = @transform_2, window_bounds = array<i64: 1, 128>}, {pipeline_mode = #tpu.pipeline_mode<synchronous>, transform_indices = @transform_3, window_bounds = array<i64: 1, 128>}, {pipeline_mode = #tpu.pipeline_mode<synchronous>, transform_indices = @transform_4, window_bounds = array<i64: 640, 128>}, {pipeline_mode = #tpu.pipeline_mode<synchronous>, transform_indices = @transform_5, window_bounds = array<i64: 1, 128>}, {pipeline_mode = #tpu.pipeline_mode<synchronous>, transform_indices = @transform_6, window_bounds = array<i64: 1, 128>}, {pipeline_mode = #tpu.pipeline_mode<synchronous>, transform_indices = @transform_7, window_bounds = array<i64: 640, 128>}, {pipeline_mode = #tpu.pipeline_mode<synchronous>, transform_indices = @transform_8, window_bounds = array<i64: 1, 128>}, {pipeline_mode = #tpu.pipeline_mode<synchronous>, transform_indices = @transform_9, window_bounds = array<i64: 1, 128>}, {pipeline_mode = #tpu.pipeline_mode<synchronous>, transform_indices = @transform_10, window_bounds = array<i64: 640, 128>}, {pipeline_mode = #tpu.pipeline_mode<synchronous>, transform_indices = @transform_11, window_bounds = array<i64: 1, 128>}, {pipeline_mode = #tpu.pipeline_mode<synchronous>, transform_indices = @transform_12, window_bounds = array<i64: 1, 128>}, {pipeline_mode = #tpu.pipeline_mode<synchronous>, transform_indices = @transform_13, window_bounds = array<i64: 2, 128, 128>}, {pipeline_mode = #tpu.pipeline_mode<synchronous>, transform_indices = @transform_14, window_bounds = array<i64: 1, 128>}, {pipeline_mode = #tpu.pipeline_mode<synchronous>, transform_indices = @transform_15, window_bounds = array<i64: 128, 128>}, {pipeline_mode = #tpu.pipeline_mode<synchronous>, transform_indices = @transform_16, window_bounds = array<i64: 1, 128>}, {transform_indices = @transform_17, window_bounds = array<i64: 2, 128>}]} {
    %cst = arith.constant 0.000000e+00 : f32
    %0 = vector.broadcast %cst : f32 to vector<64x128xf32>
    %c0 = arith.constant 0 : index
    %c0_0 = arith.constant 0 : index
    %c0_1 = arith.constant 0 : index
    %1 = vector.load %arg1[%c0, %c0_0, %c0_1] : memref<2x36x3xf32, #tpu.memory_space<vmem>>, vector<2x32x3xf32>
    %2 = vector.shape_cast %1 : vector<2x32x3xf32> to vector<64x3xf32>
    %3 = arith.truncf %2 : vector<64x3xf32> to vector<64x3xbf16>
    %c0_2 = arith.constant 0 : index
    %c0_3 = arith.constant 0 : index
    %c0_4 = arith.constant 0 : index
    %4 = vector.load %arg2[%c0_2, %c0_3, %c0_4] : memref<5x3x128xbf16, #tpu.memory_space<vmem>>, vector<1x3x128xbf16>
    %5 = vector.shape_cast %4 : vector<1x3x128xbf16> to vector<3x128xbf16>
    %cst_5 = arith.constant dense<0.000000e+00> : vector<64x128xf32>
    %6 = tpu.matmul %3, %5, %cst_5 {dimension_numbers = #tpu.dot_dimension_numbers<[1], [0], [0], [1], [0, 0, 1, 1], [], []>} : vector<64x3xbf16>, vector<3x128xbf16>, vector<64x128xf32> -> vector<64x128xf32>
    %7 = arith.addf %0, %6 : vector<64x128xf32>
    %c0_6 = arith.constant 0 : index
    %c1 = arith.constant 1 : index
    %c0_7 = arith.constant 0 : index
    %8 = vector.load %arg1[%c0_6, %c1, %c0_7] : memref<2x36x3xf32, #tpu.memory_space<vmem>>, vector<2x32x3xf32>
    %9 = vector.shape_cast %8 : vector<2x32x3xf32> to vector<64x3xf32>
    %10 = arith.truncf %9 : vector<64x3xf32> to vector<64x3xbf16>
    %c1_8 = arith.constant 1 : index
    %c0_9 = arith.constant 0 : index
    %c0_10 = arith.constant 0 : index
    %11 = vector.load %arg2[%c1_8, %c0_9, %c0_10] : memref<5x3x128xbf16, #tpu.memory_space<vmem>>, vector<1x3x128xbf16>
    %12 = vector.shape_cast %11 : vector<1x3x128xbf16> to vector<3x128xbf16>
    %cst_11 = arith.constant dense<0.000000e+00> : vector<64x128xf32>
    %13 = tpu.matmul %10, %12, %cst_11 {dimension_numbers = #tpu.dot_dimension_numbers<[1], [0], [0], [1], [0, 0, 1, 1], [], []>} : vector<64x3xbf16>, vector<3x128xbf16>, vector<64x128xf32> -> vector<64x128xf32>
    %14 = arith.addf %7, %13 : vector<64x128xf32>
    %c0_12 = arith.constant 0 : index
    %c2 = arith.constant 2 : index
    %c0_13 = arith.constant 0 : index
    %15 = vector.load %arg1[%c0_12, %c2, %c0_13] : memref<2x36x3xf32, #tpu.memory_space<vmem>>, vector<2x32x3xf32>
    %16 = vector.shape_cast %15 : vector<2x32x3xf32> to vector<64x3xf32>
    %17 = arith.truncf %16 : vector<64x3xf32> to vector<64x3xbf16>
    %c2_14 = arith.constant 2 : index
    %c0_15 = arith.constant 0 : index
    %c0_16 = arith.constant 0 : index
    %18 = vector.load %arg2[%c2_14, %c0_15, %c0_16] : memref<5x3x128xbf16, #tpu.memory_space<vmem>>, vector<1x3x128xbf16>
    %19 = vector.shape_cast %18 : vector<1x3x128xbf16> to vector<3x128xbf16>
    %cst_17 = arith.constant dense<0.000000e+00> : vector<64x128xf32>
    %20 = tpu.matmul %17, %19, %cst_17 {dimension_numbers = #tpu.dot_dimension_numbers<[1], [0], [0], [1], [0, 0, 1, 1], [], []>} : vector<64x3xbf16>, vector<3x128xbf16>, vector<64x128xf32> -> vector<64x128xf32>
    %21 = arith.addf %14, %20 : vector<64x128xf32>
    %c0_18 = arith.constant 0 : index
    %c3 = arith.constant 3 : index
    %c0_19 = arith.constant 0 : index
    %22 = vector.load %arg1[%c0_18, %c3, %c0_19] : memref<2x36x3xf32, #tpu.memory_space<vmem>>, vector<2x32x3xf32>
    %23 = vector.shape_cast %22 : vector<2x32x3xf32> to vector<64x3xf32>
    %24 = arith.truncf %23 : vector<64x3xf32> to vector<64x3xbf16>
    %c3_20 = arith.constant 3 : index
    %c0_21 = arith.constant 0 : index
    %c0_22 = arith.constant 0 : index
    %25 = vector.load %arg2[%c3_20, %c0_21, %c0_22] : memref<5x3x128xbf16, #tpu.memory_space<vmem>>, vector<1x3x128xbf16>
    %26 = vector.shape_cast %25 : vector<1x3x128xbf16> to vector<3x128xbf16>
    %cst_23 = arith.constant dense<0.000000e+00> : vector<64x128xf32>
    %27 = tpu.matmul %24, %26, %cst_23 {dimension_numbers = #tpu.dot_dimension_numbers<[1], [0], [0], [1], [0, 0, 1, 1], [], []>} : vector<64x3xbf16>, vector<3x128xbf16>, vector<64x128xf32> -> vector<64x128xf32>
    %28 = arith.addf %21, %27 : vector<64x128xf32>
    %c0_24 = arith.constant 0 : index
    %c4 = arith.constant 4 : index
    %c0_25 = arith.constant 0 : index
    %29 = vector.load %arg1[%c0_24, %c4, %c0_25] : memref<2x36x3xf32, #tpu.memory_space<vmem>>, vector<2x32x3xf32>
    %30 = vector.shape_cast %29 : vector<2x32x3xf32> to vector<64x3xf32>
    %31 = arith.truncf %30 : vector<64x3xf32> to vector<64x3xbf16>
    %c4_26 = arith.constant 4 : index
    %c0_27 = arith.constant 0 : index
    %c0_28 = arith.constant 0 : index
    %32 = vector.load %arg2[%c4_26, %c0_27, %c0_28] : memref<5x3x128xbf16, #tpu.memory_space<vmem>>, vector<1x3x128xbf16>
    %33 = vector.shape_cast %32 : vector<1x3x128xbf16> to vector<3x128xbf16>
    %cst_29 = arith.constant dense<0.000000e+00> : vector<64x128xf32>
    %34 = tpu.matmul %31, %33, %cst_29 {dimension_numbers = #tpu.dot_dimension_numbers<[1], [0], [0], [1], [0, 0, 1, 1], [], []>} : vector<64x3xbf16>, vector<3x128xbf16>, vector<64x128xf32> -> vector<64x128xf32>
    %35 = arith.addf %28, %34 : vector<64x128xf32>
    %c0_30 = arith.constant 0 : index
    %c0_31 = arith.constant 0 : index
    %36 = vector.load %arg3[%c0_30, %c0_31] : memref<1x128xf32, #tpu.memory_space<vmem>>, vector<1x128xf32>
    %37 = vector.broadcast %36 : vector<1x128xf32> to vector<64x128xf32>
    %38 = arith.mulf %35, %37 : vector<64x128xf32>
    %c0_32 = arith.constant 0 : index
    %c0_33 = arith.constant 0 : index
    %39 = vector.load %arg4[%c0_32, %c0_33] : memref<1x128xf32, #tpu.memory_space<vmem>>, vector<1x128xf32>
    %40 = vector.broadcast %39 : vector<1x128xf32> to vector<64x128xf32>
    %41 = arith.addf %38, %40 : vector<64x128xf32>
    %cst_34 = arith.constant 0.000000e+00 : f32
    %42 = vector.broadcast %cst_34 : f32 to vector<64x128xf32>
    %43 = arith.maximumf %41, %42 : vector<64x128xf32>
    %44 = vector.shape_cast %43 : vector<64x128xf32> to vector<32x2x128xf32>
    %cst_35 = arith.constant dense<0xFF800000> : vector<32x128xf32>
    %45 = vector.multi_reduction <maximumf>, %44, %cst_35 [1] : vector<32x2x128xf32> to vector<32x128xf32>
    %46 = vector.shape_cast %45 : vector<32x128xf32> to vector<2x16x128xf32>
    %cst_36 = arith.constant 0.000000e+00 : f32
    %47 = vector.broadcast %cst_36 : f32 to vector<2x2x128xf32>
    %c0_37 = arith.constant 0 : index
    %c0_38 = arith.constant 0 : index
    %c0_39 = arith.constant 0 : index
    %48 = vector.load %arg19[%c0_37, %c0_38, %c0_39] : memref<2x20x128xf32, #tpu.memory_space<vmem>>, vector<2x2x128xf32>
    tpu.vector_store %arg19[%c0_37, %c0_38, %c0_39], %47 {strides = array<i32>} : memref<2x20x128xf32, #tpu.memory_space<vmem>>, vector<2x2x128xf32>,
    %c0_40 = arith.constant 0 : index
    %c2_41 = arith.constant 2 : index
    %c0_42 = arith.constant 0 : index
    %49 = vector.load %arg19[%c0_40, %c2_41, %c0_42] : memref<2x20x128xf32, #tpu.memory_space<vmem>>, vector<2x16x128xf32>
    tpu.vector_store %arg19[%c0_40, %c2_41, %c0_42], %46 {strides = array<i32>} : memref<2x20x128xf32, #tpu.memory_space<vmem>>, vector<2x16x128xf32>,
    %cst_43 = arith.constant 0.000000e+00 : f32
    %50 = vector.broadcast %cst_43 : f32 to vector<2x2x128xf32>
    %c0_44 = arith.constant 0 : index
    %c18 = arith.constant 18 : index
    %c0_45 = arith.constant 0 : index
    %51 = vector.load %arg19[%c0_44, %c18, %c0_45] : memref<2x20x128xf32, #tpu.memory_space<vmem>>, vector<2x2x128xf32>
    tpu.vector_store %arg19[%c0_44, %c18, %c0_45], %50 {strides = array<i32>} : memref<2x20x128xf32, #tpu.memory_space<vmem>>, vector<2x2x128xf32>,
    %c0_46 = arith.constant 0 : index
    %c0_47 = arith.constant 0 : index
    %c0_48 = arith.constant 0 : index
    %52 = vector.load %arg19[%c0_46, %c0_47, %c0_48] : memref<2x20x128xf32, #tpu.memory_space<vmem>>, vector<2x16x128xf32>
    %c0_49 = arith.constant 0 : index
    %c1_50 = arith.constant 1 : index
    %c0_51 = arith.constant 0 : index
    %53 = vector.load %arg19[%c0_49, %c1_50, %c0_51] : memref<2x20x128xf32, #tpu.memory_space<vmem>>, vector<2x16x128xf32>
    %c0_52 = arith.constant 0 : index
    %c2_53 = arith.constant 2 : index
    %c0_54 = arith.constant 0 : index
    %54 = vector.load %arg19[%c0_52, %c2_53, %c0_54] : memref<2x20x128xf32, #tpu.memory_space<vmem>>, vector<2x16x128xf32>
    %c0_55 = arith.constant 0 : index
    %c3_56 = arith.constant 3 : index
    %c0_57 = arith.constant 0 : index
    %55 = vector.load %arg19[%c0_55, %c3_56, %c0_57] : memref<2x20x128xf32, #tpu.memory_space<vmem>>, vector<2x16x128xf32>
    %c0_58 = arith.constant 0 : index
    %c4_59 = arith.constant 4 : index
    %c0_60 = arith.constant 0 : index
    %56 = vector.load %arg19[%c0_58, %c4_59, %c0_60] : memref<2x20x128xf32, #tpu.memory_space<vmem>>, vector<2x16x128xf32>
    %57 = tpu.concatenate %52, %53, %54, %55, %56 in 2 : vector<2x16x128xf32>, vector<2x16x128xf32>, vector<2x16x128xf32>, vector<2x16x128xf32>, vector<2x16x128xf32> -> vector<2x16x640xf32>
    %58 = vector.shape_cast %57 : vector<2x16x640xf32> to vector<32x640xf32>
    %59 = arith.truncf %58 : vector<32x640xf32> to vector<32x640xbf16>
    %c0_61 = arith.constant 0 : index
    %c0_62 = arith.constant 0 : index
    %60 = vector.load %arg5[%c0_61, %c0_62] : memref<640x128xbf16, #tpu.memory_space<vmem>>, vector<640x128xbf16>
    %cst_63 = arith.constant dense<0.000000e+00> : vector<32x128xf32>
    %61 = tpu.matmul %59, %60, %cst_63 {dimension_numbers = #tpu.dot_dimension_numbers<[1], [0], [0], [1], [0, 0, 1, 1], [], []>} : vector<32x640xbf16>, vector<640x128xbf16>, vector<32x128xf32> -> vector<32x128xf32>
    %c0_64 = arith.constant 0 : index
    %c0_65 = arith.constant 0 : index
    %62 = vector.load %arg6[%c0_64, %c0_65] : memref<1x128xf32, #tpu.memory_space<vmem>>, vector<1x128xf32>
    %63 = vector.broadcast %62 : vector<1x128xf32> to vector<32x128xf32>
    %64 = arith.mulf %61, %63 : vector<32x128xf32>
    %c0_66 = arith.constant 0 : index
    %c0_67 = arith.constant 0 : index
    %65 = vector.load %arg7[%c0_66, %c0_67] : memref<1x128xf32, #tpu.memory_space<vmem>>, vector<1x128xf32>
    %66 = vector.broadcast %65 : vector<1x128xf32> to vector<32x128xf32>
    %67 = arith.addf %64, %66 : vector<32x128xf32>
    %cst_68 = arith.constant 0.000000e+00 : f32
    %68 = vector.broadcast %cst_68 : f32 to vector<32x128xf32>
    %69 = arith.maximumf %67, %68 : vector<32x128xf32>
    %70 = vector.shape_cast %69 : vector<32x128xf32> to vector<16x2x128xf32>
    %cst_69 = arith.constant dense<0xFF800000> : vector<16x128xf32>
    %71 = vector.multi_reduction <maximumf>, %70, %cst_69 [1] : vector<16x2x128xf32> to vector<16x128xf32>
    %72 = vector.shape_cast %71 : vector<16x128xf32> to vector<2x8x128xf32>
    %c0_70 = arith.constant 0 : index
    %c2_71 = arith.constant 2 : index
    %c0_72 = arith.constant 0 : index
    %73 = vector.load %arg19[%c0_70, %c2_71, %c0_72] : memref<2x20x128xf32, #tpu.memory_space<vmem>>, vector<2x8x128xf32>
    tpu.vector_store %arg19[%c0_70, %c2_71, %c0_72], %72 {strides = array<i32>} : memref<2x20x128xf32, #tpu.memory_space<vmem>>, vector<2x8x128xf32>,
    %cst_73 = arith.constant 0.000000e+00 : f32
    %74 = vector.broadcast %cst_73 : f32 to vector<2x2x128xf32>
    %c0_74 = arith.constant 0 : index
    %c10 = arith.constant 10 : index
    %c0_75 = arith.constant 0 : index
    %75 = vector.load %arg19[%c0_74, %c10, %c0_75] : memref<2x20x128xf32, #tpu.memory_space<vmem>>, vector<2x2x128xf32>
    tpu.vector_store %arg19[%c0_74, %c10, %c0_75], %74 {strides = array<i32>} : memref<2x20x128xf32, #tpu.memory_space<vmem>>, vector<2x2x128xf32>,
    %c0_76 = arith.constant 0 : index
    %c0_77 = arith.constant 0 : index
    %c0_78 = arith.constant 0 : index
    %76 = vector.load %arg19[%c0_76, %c0_77, %c0_78] : memref<2x20x128xf32, #tpu.memory_space<vmem>>, vector<2x8x128xf32>
    %c0_79 = arith.constant 0 : index
    %c1_80 = arith.constant 1 : index
    %c0_81 = arith.constant 0 : index
    %77 = vector.load %arg19[%c0_79, %c1_80, %c0_81] : memref<2x20x128xf32, #tpu.memory_space<vmem>>, vector<2x8x128xf32>
    %c0_82 = arith.constant 0 : index
    %c2_83 = arith.constant 2 : index
    %c0_84 = arith.constant 0 : index
    %78 = vector.load %arg19[%c0_82, %c2_83, %c0_84] : memref<2x20x128xf32, #tpu.memory_space<vmem>>, vector<2x8x128xf32>
    %c0_85 = arith.constant 0 : index
    %c3_86 = arith.constant 3 : index
    %c0_87 = arith.constant 0 : index
    %79 = vector.load %arg19[%c0_85, %c3_86, %c0_87] : memref<2x20x128xf32, #tpu.memory_space<vmem>>, vector<2x8x128xf32>
    %c0_88 = arith.constant 0 : index
    %c4_89 = arith.constant 4 : index
    %c0_90 = arith.constant 0 : index
    %80 = vector.load %arg19[%c0_88, %c4_89, %c0_90] : memref<2x20x128xf32, #tpu.memory_space<vmem>>, vector<2x8x128xf32>
    %81 = tpu.concatenate %76, %77, %78, %79, %80 in 2 : vector<2x8x128xf32>, vector<2x8x128xf32>, vector<2x8x128xf32>, vector<2x8x128xf32>, vector<2x8x128xf32> -> vector<2x8x640xf32>
    %82 = vector.shape_cast %81 : vector<2x8x640xf32> to vector<16x640xf32>
    %83 = arith.truncf %82 : vector<16x640xf32> to vector<16x640xbf16>
    %c0_91 = arith.constant 0 : index
    %c0_92 = arith.constant 0 : index
    %84 = vector.load %arg8[%c0_91, %c0_92] : memref<640x128xbf16, #tpu.memory_space<vmem>>, vector<640x128xbf16>
    %cst_93 = arith.constant dense<0.000000e+00> : vector<16x128xf32>
    %85 = tpu.matmul %83, %84, %cst_93 {dimension_numbers = #tpu.dot_dimension_numbers<[1], [0], [0], [1], [0, 0, 1, 1], [], []>} : vector<16x640xbf16>, vector<640x128xbf16>, vector<16x128xf32> -> vector<16x128xf32>
    %c0_94 = arith.constant 0 : index
    %c0_95 = arith.constant 0 : index
    %86 = vector.load %arg9[%c0_94, %c0_95] : memref<1x128xf32, #tpu.memory_space<vmem>>, vector<1x128xf32>
    %87 = vector.broadcast %86 : vector<1x128xf32> to vector<16x128xf32>
    %88 = arith.mulf %85, %87 : vector<16x128xf32>
    %c0_96 = arith.constant 0 : index
    %c0_97 = arith.constant 0 : index
    %89 = vector.load %arg10[%c0_96, %c0_97] : memref<1x128xf32, #tpu.memory_space<vmem>>, vector<1x128xf32>
    %90 = vector.broadcast %89 : vector<1x128xf32> to vector<16x128xf32>
    %91 = arith.addf %88, %90 : vector<16x128xf32>
    %cst_98 = arith.constant 0.000000e+00 : f32
    %92 = vector.broadcast %cst_98 : f32 to vector<16x128xf32>
    %93 = arith.maximumf %91, %92 : vector<16x128xf32>
    %94 = vector.shape_cast %93 : vector<16x128xf32> to vector<8x2x128xf32>
    %cst_99 = arith.constant dense<0xFF800000> : vector<8x128xf32>
    %95 = vector.multi_reduction <maximumf>, %94, %cst_99 [1] : vector<8x2x128xf32> to vector<8x128xf32>
    %96 = vector.shape_cast %95 : vector<8x128xf32> to vector<2x4x128xf32>
    %c0_100 = arith.constant 0 : index
    %c2_101 = arith.constant 2 : index
    %c0_102 = arith.constant 0 : index
    %97 = vector.load %arg19[%c0_100, %c2_101, %c0_102] : memref<2x20x128xf32, #tpu.memory_space<vmem>>, vector<2x4x128xf32>
    tpu.vector_store %arg19[%c0_100, %c2_101, %c0_102], %96 {strides = array<i32>} : memref<2x20x128xf32, #tpu.memory_space<vmem>>, vector<2x4x128xf32>,
    %cst_103 = arith.constant 0.000000e+00 : f32
    %98 = vector.broadcast %cst_103 : f32 to vector<2x2x128xf32>
    %c0_104 = arith.constant 0 : index
    %c6 = arith.constant 6 : index
    %c0_105 = arith.constant 0 : index
    %99 = vector.load %arg19[%c0_104, %c6, %c0_105] : memref<2x20x128xf32, #tpu.memory_space<vmem>>, vector<2x2x128xf32>
    tpu.vector_store %arg19[%c0_104, %c6, %c0_105], %98 {strides = array<i32>} : memref<2x20x128xf32, #tpu.memory_space<vmem>>, vector<2x2x128xf32>,
    %c0_106 = arith.constant 0 : index
    %c0_107 = arith.constant 0 : index
    %c0_108 = arith.constant 0 : index
    %100 = vector.load %arg19[%c0_106, %c0_107, %c0_108] : memref<2x20x128xf32, #tpu.memory_space<vmem>>, vector<2x4x128xf32>
    %c0_109 = arith.constant 0 : index
    %c1_110 = arith.constant 1 : index
    %c0_111 = arith.constant 0 : index
    %101 = vector.load %arg19[%c0_109, %c1_110, %c0_111] : memref<2x20x128xf32, #tpu.memory_space<vmem>>, vector<2x4x128xf32>
    %c0_112 = arith.constant 0 : index
    %c2_113 = arith.constant 2 : index
    %c0_114 = arith.constant 0 : index
    %102 = vector.load %arg19[%c0_112, %c2_113, %c0_114] : memref<2x20x128xf32, #tpu.memory_space<vmem>>, vector<2x4x128xf32>
    %c0_115 = arith.constant 0 : index
    %c3_116 = arith.constant 3 : index
    %c0_117 = arith.constant 0 : index
    %103 = vector.load %arg19[%c0_115, %c3_116, %c0_117] : memref<2x20x128xf32, #tpu.memory_space<vmem>>, vector<2x4x128xf32>
    %c0_118 = arith.constant 0 : index
    %c4_119 = arith.constant 4 : index
    %c0_120 = arith.constant 0 : index
    %104 = vector.load %arg19[%c0_118, %c4_119, %c0_120] : memref<2x20x128xf32, #tpu.memory_space<vmem>>, vector<2x4x128xf32>
    %105 = tpu.concatenate %100, %101, %102, %103, %104 in 2 : vector<2x4x128xf32>, vector<2x4x128xf32>, vector<2x4x128xf32>, vector<2x4x128xf32>, vector<2x4x128xf32> -> vector<2x4x640xf32>
    %106 = vector.shape_cast %105 : vector<2x4x640xf32> to vector<8x640xf32>
    %107 = arith.truncf %106 : vector<8x640xf32> to vector<8x640xbf16>
    %c0_121 = arith.constant 0 : index
    %c0_122 = arith.constant 0 : index
    %108 = vector.load %arg11[%c0_121, %c0_122] : memref<640x128xbf16, #tpu.memory_space<vmem>>, vector<640x128xbf16>
    %cst_123 = arith.constant dense<0.000000e+00> : vector<8x128xf32>
    %109 = tpu.matmul %107, %108, %cst_123 {dimension_numbers = #tpu.dot_dimension_numbers<[1], [0], [0], [1], [0, 0, 1, 1], [], []>} : vector<8x640xbf16>, vector<640x128xbf16>, vector<8x128xf32> -> vector<8x128xf32>
    %c0_124 = arith.constant 0 : index
    %c0_125 = arith.constant 0 : index
    %110 = vector.load %arg12[%c0_124, %c0_125] : memref<1x128xf32, #tpu.memory_space<vmem>>, vector<1x128xf32>
    %111 = vector.broadcast %110 : vector<1x128xf32> to vector<8x128xf32>
    %112 = arith.mulf %109, %111 : vector<8x128xf32>
    %c0_126 = arith.constant 0 : index
    %c0_127 = arith.constant 0 : index
    %113 = vector.load %arg13[%c0_126, %c0_127] : memref<1x128xf32, #tpu.memory_space<vmem>>, vector<1x128xf32>
    %114 = vector.broadcast %113 : vector<1x128xf32> to vector<8x128xf32>
    %115 = arith.addf %112, %114 : vector<8x128xf32>
    %cst_128 = arith.constant 0.000000e+00 : f32
    %116 = vector.broadcast %cst_128 : f32 to vector<8x128xf32>
    %117 = arith.maximumf %115, %116 : vector<8x128xf32>
    %118 = vector.shape_cast %117 : vector<8x128xf32> to vector<4x2x128xf32>
    %cst_129 = arith.constant dense<0xFF800000> : vector<4x128xf32>
    %119 = vector.multi_reduction <maximumf>, %118, %cst_129 [1] : vector<4x2x128xf32> to vector<4x128xf32>
    %120 = vector.shape_cast %119 : vector<4x128xf32> to vector<2x2x128xf32>
    %cst_130 = arith.constant 0.000000e+00 : f32
    %121 = vector.broadcast %cst_130 : f32 to vector<2x128xf32>
    %122 = vector.extract_strided_slice %120 {offsets = [0, 0, 0], sizes = [2, 1, 128], strides = [1, 1, 1]} : vector<2x2x128xf32> to vector<2x1x128xf32>
    %123 = vector.shape_cast %122 : vector<2x1x128xf32> to vector<2x128xf32>
    %124 = arith.truncf %123 : vector<2x128xf32> to vector<2x128xbf16>
    %c0_131 = arith.constant 0 : index
    %c0_132 = arith.constant 0 : index
    %c0_133 = arith.constant 0 : index
    %125 = vector.load %arg14[%c0_131, %c0_132, %c0_133] : memref<2x128x128xbf16, #tpu.memory_space<vmem>>, vector<1x128x128xbf16>
    %126 = vector.shape_cast %125 : vector<1x128x128xbf16> to vector<128x128xbf16>
    %cst_134 = arith.constant dense<0.000000e+00> : vector<2x128xf32>
    %127 = tpu.matmul %124, %126, %cst_134 {dimension_numbers = #tpu.dot_dimension_numbers<[1], [0], [0], [1], [0, 0, 1, 1], [], []>} : vector<2x128xbf16>, vector<128x128xbf16>, vector<2x128xf32> -> vector<2x128xf32>
    %128 = arith.addf %121, %127 : vector<2x128xf32>
    %129 = vector.extract_strided_slice %120 {offsets = [0, 1, 0], sizes = [2, 1, 128], strides = [1, 1, 1]} : vector<2x2x128xf32> to vector<2x1x128xf32>
    %130 = vector.shape_cast %129 : vector<2x1x128xf32> to vector<2x128xf32>
    %131 = arith.truncf %130 : vector<2x128xf32> to vector<2x128xbf16>
    %c1_135 = arith.constant 1 : index
    %c0_136 = arith.constant 0 : index
    %c0_137 = arith.constant 0 : index
    %132 = vector.load %arg14[%c1_135, %c0_136, %c0_137] : memref<2x128x128xbf16, #tpu.memory_space<vmem>>, vector<1x128x128xbf16>
    %133 = vector.shape_cast %132 : vector<1x128x128xbf16> to vector<128x128xbf16>
    %cst_138 = arith.constant dense<0.000000e+00> : vector<2x128xf32>
    %134 = tpu.matmul %131, %133, %cst_138 {dimension_numbers = #tpu.dot_dimension_numbers<[1], [0], [0], [1], [0, 0, 1, 1], [], []>} : vector<2x128xbf16>, vector<128x128xbf16>, vector<2x128xf32> -> vector<2x128xf32>
    %135 = arith.addf %128, %134 : vector<2x128xf32>
    %c0_139 = arith.constant 0 : index
    %c0_140 = arith.constant 0 : index
    %136 = vector.load %arg15[%c0_139, %c0_140] : memref<1x128xf32, #tpu.memory_space<vmem>>, vector<1x128xf32>
    %137 = vector.broadcast %136 : vector<1x128xf32> to vector<2x128xf32>
    %138 = arith.addf %135, %137 : vector<2x128xf32>
    %cst_141 = arith.constant 0.000000e+00 : f32
    %139 = vector.broadcast %cst_141 : f32 to vector<2x128xf32>
    %140 = arith.maximumf %138, %139 : vector<2x128xf32>
    %141 = arith.truncf %140 : vector<2x128xf32> to vector<2x128xbf16>
    %c0_142 = arith.constant 0 : index
    %c0_143 = arith.constant 0 : index
    %142 = vector.load %arg16[%c0_142, %c0_143] : memref<128x128xbf16, #tpu.memory_space<vmem>>, vector<128x128xbf16>
    %cst_144 = arith.constant dense<0.000000e+00> : vector<2x128xf32>
    %143 = tpu.matmul %141, %142, %cst_144 {dimension_numbers = #tpu.dot_dimension_numbers<[1], [0], [0], [1], [0, 0, 1, 1], [], []>} : vector<2x128xbf16>, vector<128x128xbf16>, vector<2x128xf32> -> vector<2x128xf32>
    %c0_145 = arith.constant 0 : index
    %c0_146 = arith.constant 0 : index
    %144 = vector.load %arg17[%c0_145, %c0_146] : memref<1x128xf32, #tpu.memory_space<vmem>>, vector<1x128xf32>
    %145 = vector.broadcast %144 : vector<1x128xf32> to vector<2x128xf32>
    %146 = arith.addf %143, %145 : vector<2x128xf32>
    %c0_147 = arith.constant 0 : index
    %c0_148 = arith.constant 0 : index
    %147 = vector.load %arg18[%c0_147, %c0_148] : memref<2x128xf32, #tpu.memory_space<vmem>>, vector<2x128xf32>
    tpu.vector_store %arg18[%c0_147, %c0_148], %146 {strides = array<i32>} : memref<2x128xf32, #tpu.memory_space<vmem>>, vector<2x128xf32>,
    return
  }
  func.func @transform_0(%arg0: i32) -> (i32, i32, i32) {
    %c0_i32 = arith.constant 0 : i32
    %c0_i32_0 = arith.constant 0 : i32
    %c0_i32_1 = arith.constant 0 : i32
    return %arg0, %c0_i32, %c0_i32_0 : i32, i32, i32
  }
  func.func @transform_1(%arg0: i32) -> (i32, i32, i32) {
    %c0_i32 = arith.constant 0 : i32
    %c0_i32_0 = arith.constant 0 : i32
    %c0_i32_1 = arith.constant 0 : i32
    %c0_i32_2 = arith.constant 0 : i32
    return %c0_i32, %c0_i32_0, %c0_i32_1 : i32, i32, i32
  }
  func.func @transform_2(%arg0: i32) -> (i32, i32) {
    %c0_i32 = arith.constant 0 : i32
    %c0_i32_0 = arith.constant 0 : i32
    %c0_i32_1 = arith.constant 0 : i32
    return %c0_i32, %c0_i32_0 : i32, i32
  }
  func.func @transform_3(%arg0: i32) -> (i32, i32) {
    %c0_i32 = arith.constant 0 : i32
    %c0_i32_0 = arith.constant 0 : i32
    %c0_i32_1 = arith.constant 0 : i32
    return %c0_i32, %c0_i32_0 : i32, i32
  }
  func.func @transform_4(%arg0: i32) -> (i32, i32) {
    %c0_i32 = arith.constant 0 : i32
    %c0_i32_0 = arith.constant 0 : i32
    %c0_i32_1 = arith.constant 0 : i32
    return %c0_i32, %c0_i32_0 : i32, i32
  }
  func.func @transform_5(%arg0: i32) -> (i32, i32) {
    %c0_i32 = arith.constant 0 : i32
    %c0_i32_0 = arith.constant 0 : i32
    %c0_i32_1 = arith.constant 0 : i32
    return %c0_i32, %c0_i32_0 : i32, i32
  }
  func.func @transform_6(%arg0: i32) -> (i32, i32) {
    %c0_i32 = arith.constant 0 : i32
    %c0_i32_0 = arith.constant 0 : i32
    %c0_i32_1 = arith.constant 0 : i32
    return %c0_i32, %c0_i32_0 : i32, i32
  }
  func.func @transform_7(%arg0: i32) -> (i32, i32) {
    %c0_i32 = arith.constant 0 : i32
    %c0_i32_0 = arith.constant 0 : i32
    %c0_i32_1 = arith.constant 0 : i32
    return %c0_i32, %c0_i32_0 : i32, i32
  }
  func.func @transform_8(%arg0: i32) -> (i32, i32) {
    %c0_i32 = arith.constant 0 : i32
    %c0_i32_0 = arith.constant 0 : i32
    %c0_i32_1 = arith.constant 0 : i32
    return %c0_i32, %c0_i32_0 : i32, i32
  }
  func.func @transform_9(%arg0: i32) -> (i32, i32) {
    %c0_i32 = arith.constant 0 : i32
    %c0_i32_0 = arith.constant 0 : i32
    %c0_i32_1 = arith.constant 0 : i32
    return %c0_i32, %c0_i32_0 : i32, i32
  }
  func.func @transform_10(%arg0: i32) -> (i32, i32) {
    %c0_i32 = arith.constant 0 : i32
    %c0_i32_0 = arith.constant 0 : i32
    %c0_i32_1 = arith.constant 0 : i32
    return %c0_i32, %c0_i32_0 : i32, i32
  }
  func.func @transform_11(%arg0: i32) -> (i32, i32) {
    %c0_i32 = arith.constant 0 : i32
    %c0_i32_0 = arith.constant 0 : i32
    %c0_i32_1 = arith.constant 0 : i32
    return %c0_i32, %c0_i32_0 : i32, i32
  }
  func.func @transform_12(%arg0: i32) -> (i32, i32) {
    %c0_i32 = arith.constant 0 : i32
    %c0_i32_0 = arith.constant 0 : i32
    %c0_i32_1 = arith.constant 0 : i32
    return %c0_i32, %c0_i32_0 : i32, i32
  }
  func.func @transform_13(%arg0: i32) -> (i32, i32, i32) {
    %c0_i32 = arith.constant 0 : i32
    %c0_i32_0 = arith.constant 0 : i32
    %c0_i32_1 = arith.constant 0 : i32
    %c0_i32_2 = arith.constant 0 : i32
    return %c0_i32, %c0_i32_0, %c0_i32_1 : i32, i32, i32
  }
  func.func @transform_14(%arg0: i32) -> (i32, i32) {
    %c0_i32 = arith.constant 0 : i32
    %c0_i32_0 = arith.constant 0 : i32
    %c0_i32_1 = arith.constant 0 : i32
    return %c0_i32, %c0_i32_0 : i32, i32
  }
  func.func @transform_15(%arg0: i32) -> (i32, i32) {
    %c0_i32 = arith.constant 0 : i32
    %c0_i32_0 = arith.constant 0 : i32
    %c0_i32_1 = arith.constant 0 : i32
    return %c0_i32, %c0_i32_0 : i32, i32
  }
  func.func @transform_16(%arg0: i32) -> (i32, i32) {
    %c0_i32 = arith.constant 0 : i32
    %c0_i32_0 = arith.constant 0 : i32
    %c0_i32_1 = arith.constant 0 : i32
    return %c0_i32, %c0_i32_0 : i32, i32
  }
  func.func @transform_17(%arg0: i32) -> (i32, i32) {
    %c0_i32 = arith.constant 0 : i32
    %c0_i32_0 = arith.constant 0 : i32
    return %arg0, %c0_i32 : i32, i32
  }
}

</mosaic_0001>

<bundles_post_ra>
// kernel: tstr_classifier_forward.1
= control target key start
LH: loop header
LB: loop body
LE: loop exit
PB: predicated region body
PF: predicated region fallthrough
CT: control target
= control target key end

     0   :  { %s5113_s0 = inlined_call_operand.vmem [shape: f32[2,36,3], index: 0, kind: input, shape index: {}]   ;;  %s5114_s1 = inlined_call_operand.vmem [shape: bf16[5,3,128], index: 1, kind: input, shape index: {}]   ;;  %s5115_s2 = inlined_call_operand.vmem [shape: f32[1,128], index: 2, kind: input, shape index: {}]   ;;  %s5116_s3 = inlined_call_operand.vmem [shape: f32[1,128], index: 3, kind: input, shape index: {}]   ;;  %s5117_s4 = inlined_call_operand.vmem [shape: bf16[640,128], index: 4, kind: input, shape index: {}]   ;;  %s5118_s5 = inlined_call_operand.vmem [shape: f32[1,128], index: 5, kind: input, shape index: {}]   ;;  %s5119_s6 = inlined_call_operand.vmem [shape: f32[1,128], index: 6, kind: input, shape index: {}]   ;;  %s5120_s7 = inlined_call_operand.vmem [shape: bf16[640,128], index: 7, kind: input, shape index: {}]   ;;  %s5121_s8 = inlined_call_operand.vmem [shape: f32[1,128], index: 8, kind: input, shape index: {}]   ;;  %s5122_s9 = inlined_call_operand.vmem [shape: f32[1,128], index: 9, kind: input, shape index: {}]   ;;  %s5123_s10 = inlined_call_operand.vmem [shape: bf16[640,128], index: 10, kind: input, shape index: {}]   ;;  %s5124_s11 = inlined_call_operand.vmem [shape: f32[1,128], index: 11, kind: input, shape index: {}]   ;;  %s5125_s12 = inlined_call_operand.vmem [shape: f32[1,128], index: 12, kind: input, shape index: {}]   ;;  %s5126_s13 = inlined_call_operand.vmem [shape: bf16[2,128,128], index: 13, kind: input, shape index: {}]   ;;  %s5127_s14 = inlined_call_operand.vmem [shape: f32[1,128], index: 14, kind: input, shape index: {}]   ;;  %s5128_s15 = inlined_call_operand.vmem [shape: bf16[128,128], index: 15, kind: input, shape index: {}]   ;;  %s5129_s16 = inlined_call_operand.vmem [shape: f32[1,128], index: 16, kind: input, shape index: {}]   ;;  %s5130_s17 = inlined_call_operand.hbm [shape: f32[2,128], index: 17, kind: output, shape index: {}]  }
   0x1   :  { %5133 = sst [smem:[#allocation6_spill]] %s5113_s0 }
   0x2   :  { %5134 = sst [smem:[#allocation7_spill]] %s5114_s1 }
   0x3   :  { %s5135_s26 = sld [smem:[#allocation7_spill]]  ;;  %vm98_vm0 = vcmask 1040384   ;;  %vm99_vm1 = vcmask 1041408   ;;  %v4109_v2 = vmov 65535   ;;  %vm85_vm2 = vcmask 23552  }
   0x4   :  { %s5136_s29 = sld [smem:[#allocation6_spill]]  ;;  %v100_v3 = vsel %vm98_vm0, 4294967295, %v4109_v2 }
   0x5   :  { %v101_v7 = vsel %vm99_vm1, %v100_v3, 0 }
   0x9   :  { %v3339_v0 = vld [vmem:[%s5135_s26 + $0x2] sm:$0x3]  ;;  %v70_v15 = vld [vmem:[%s5135_s26] sm:$0x3]  ;;  %v3348_v16 = vld [vmem:[%s5135_s26 + $0x4] sm:$0x3] }
   0xa   :  { %v71_v1 = vld [vmem:[%s5136_s29 + $0x1] sm:$0xff]  ;;  %v72_v4 = vld [vmem:[%s5136_s29 + $0x9] sm:$0xff]  ;;  %v76_v6 = vld [vmem:[%s5136_s29 + $0x31] sm:$0xff]  ;;  %v103_v13 = vand.u32 %v3339_v0, %v101_v7  ;;  %v183_v17 = vand.u32 %v101_v7, %v70_v15  ;;  %v277_v18 = vand.u32 %v3348_v16, %v101_v7 }
   0xb   :  { %v75_v5 = vld [vmem:[%s5136_s29 + $0x29] sm:$0xff]  ;;  %v79_v8 = vpack.c.bf16 %v72_v4, %v71_v1  ;;  %v73_v10 = vld [vmem:[%s5136_s29 + $0x11] sm:$0xff]  ;;  %v74_v11 = vld [vmem:[%s5136_s29 + $0x19] sm:$0xff] }
   0xc   :  { %v81_v9 = vpack.c.bf16 %v76_v6, %v75_v5  ;;  %v77_v12 = vld [vmem:[%s5136_s29 + $0x39] sm:$0xff]  ;;  %v78_v14 = vld [vmem:[%s5136_s29 + $0x41] sm:$0xff]  ;;  %3761 = vmatprep.subr.bf16.mxu0 %v103_v13  ;;  %3931 = vmatprep.subr.bf16.mxu1 %v103_v13  ;;  %v80_v22 = vpack.c.bf16 %v74_v11, %v73_v10  ;;  %v251_v24 = vld [vmem:[%s5136_s29 + $0xa] sm:$0xff] }
   0xd   :  { %3763 = vmatprep.mubr.msk.bf16.mxu0 %vm85_vm2, %v79_v8  ;;  %v58_v19 = vld [vmem:[%s5136_s29] sm:$0xff]  ;;  %v59_v20 = vld [vmem:[%s5136_s29 + $0x8] sm:$0xff]  ;;  %v82_v23 = vpack.c.bf16 %v78_v14, %v77_v12  ;;  %3762 = vmatpush3.bf16.msra.mxu0 %v103_v13  ;;  %v60_v31 = vld [vmem:[%s5136_s29 + $0x10] sm:$0xff] }
   0xe   :  { %3767 = vmatprep.mubr.msk.bf16.mxu1 %vm85_vm2, %v81_v9  ;;  %v250_v21 = vld [vmem:[%s5136_s29 + $0x2] sm:$0xff]  ;;  %3932 = vmatpush3.bf16.msra.mxu1 %v103_v13  ;;  %v66_v26 = vpack.c.bf16 %v59_v20, %v58_v19  ;;  %v61_v32 = vld [vmem:[%s5136_s29 + $0x18] sm:$0xff]  ;;  %v63_v36 = vld [vmem:[%s5136_s29 + $0x30] sm:$0xff] }
   0xf   :  { %v3353_v25 = vld [vmem:[%s5135_s26 + $0x6] sm:$0x3]  ;;  %3771 = vmatprep.subr.bf16.mxu1 %v183_v17  ;;  %3781 = vmatprep.subr.bf16.mxu0 %v277_v18  ;;  %v258_v27 = vpack.c.bf16 %v251_v24, %v250_v21  ;;  %v3358_v28 = vld [vmem:[%s5135_s26 + $0x8] sm:$0x3]  ;;  %v252_v33 = vld [vmem:[%s5136_s29 + $0x12] sm:$0xff]  ;;  %v67_v39 = vpack.c.bf16 %v61_v32, %v60_v31 }
  0x10   :  { %v379_v29 = vand.u32 %v3353_v25, %v101_v7  ;;  %v481_v30 = vand.u32 %v3358_v28, %v101_v7  ;;  %3764 = vmatmul.mubr.msk.bf16.vlgmr.msra.gmra.mxu0 %vm85_vm2, %v80_v22  ;;  %v253_v34 = vld [vmem:[%s5136_s29 + $0x1a] sm:$0xff]  ;;  %v62_v35 = vld [vmem:[%s5136_s29 + $0x28] sm:$0xff]  ;;  %v255_v38 = vld [vmem:[%s5136_s29 + $0x32] sm:$0xff] }
  0x11   :  { %3768 = vmatmul.mubr.msk.bf16.vlgmr.msra.gmra.mxu1 %vm85_vm2, %v82_v23  ;;  %3782 = vmatpush3.bf16.msra.mxu0 %v277_v18  ;;  %v254_v37 = vld [vmem:[%s5136_s29 + $0x2a] sm:$0xff]  ;;  %v259_v40 = vpack.c.bf16 %v253_v34, %v252_v33  ;;  %v68_v41 = vpack.c.bf16 %v63_v36, %v62_v35  ;;  %v64_v43 = vld [vmem:[%s5136_s29 + $0x38] sm:$0xff]  ;;  %v65_v44 = vld [vmem:[%s5136_s29 + $0x40] sm:$0xff] }
  0x12   :  { %3772 = vmatpush3.bf16.msra.mxu1 %v183_v17  ;;  %3773 = vmatprep.mubr.msk.bf16.mxu1 %vm85_vm2, %v66_v26  ;;  %v260_v42 = vpack.c.bf16 %v255_v38, %v254_v37  ;;  %v256_v45 = vld [vmem:[%s5136_s29 + $0x3a] sm:$0xff]  ;;  %v257_v46 = vld [vmem:[%s5136_s29 + $0x42] sm:$0xff]  ;;  %v353_v48 = vld [vmem:[%s5136_s29 + $0xb] sm:$0xff]  ;;  %v69_v51 = vpack.c.bf16 %v65_v44, %v64_v43 }
  0x13   :  { %3783 = vmatprep.mubr.msk.bf16.mxu0 %vm85_vm2, %v258_v27  ;;  %3791 = vmatprep.subr.bf16.mxu1 %v379_v29  ;;  %v352_v47 = vld [vmem:[%s5136_s29 + $0x3] sm:$0xff]  ;;  %v455_v50 = vld [vmem:[%s5136_s29 + $0xc] sm:$0xff]  ;;  %v261_v52 = vpack.c.bf16 %v257_v46, %v256_v45  ;;  %v355_v56 = vld [vmem:[%s5136_s29 + $0x1b] sm:$0xff] }
  0x14   :  { %3801 = vmatprep.subr.bf16.mxu0 %v481_v30  ;;  %v454_v49 = vld [vmem:[%s5136_s29 + $0x4] sm:$0xff]  ;;  %v360_v53 = vpack.c.bf16 %v353_v48, %v352_v47  ;;  %v354_v55 = vld [vmem:[%s5136_s29 + $0x13] sm:$0xff]  ;;  %v457_v58 = vld [vmem:[%s5136_s29 + $0x1c] sm:$0xff] }
  0x15   :  { %v462_v54 = vpack.c.bf16 %v455_v50, %v454_v49  ;;  %v456_v57 = vld [vmem:[%s5136_s29 + $0x14] sm:$0xff]  ;;  %v356_v59 = vld [vmem:[%s5136_s29 + $0x2b] sm:$0xff]  ;;  %v361_v63 = vpack.c.bf16 %v355_v56, %v354_v55  ;;  %v359_v4 = vld [vmem:[%s5136_s29 + $0x43] sm:$0xff] }
  0x16   :  { %v357_v60 = vld [vmem:[%s5136_s29 + $0x33] sm:$0xff]  ;;  %v463_v0 = vpack.c.bf16 %v457_v58, %v456_v57  ;;  %v358_v3 = vld [vmem:[%s5136_s29 + $0x3b] sm:$0xff]  ;;  %v461_v6 = vld [vmem:[%s5136_s29 + $0x44] sm:$0xff] }
  0x17   :  { %v458_v61 = vld [vmem:[%s5136_s29 + $0x2c] sm:$0xff]  ;;  %v459_v62 = vld [vmem:[%s5136_s29 + $0x34] sm:$0xff]  ;;  %v362_v1 = vpack.c.bf16 %v357_v60, %v356_v59  ;;  %v460_v5 = vld [vmem:[%s5136_s29 + $0x3c] sm:$0xff]  ;;  %v363_v7 = vpack.c.bf16 %v359_v4, %v358_v3 }
  0x18   :  { %3784 = vmatmul.mubr.msk.bf16.vlgmr.msra.gmra.mxu0 %vm85_vm2, %v259_v40  ;;  %v464_v2 = vpack.c.bf16 %v459_v62, %v458_v61  ;;  %v465_v8 = vpack.c.bf16 %v461_v6, %v460_v5 }
  0x19   :  { %3774 = vmatmul.mubr.msk.bf16.vlgmr.msra.gmra.mxu1 %vm85_vm2, %v67_v39  ;;  %3802 = vmatpush3.bf16.msra.mxu0 %v481_v30 }
  0x1a   :  { %3792 = vmatpush3.bf16.msra.mxu1 %v379_v29  ;;  %3777 = vmatprep.mubr.msk.bf16.mxu1 %vm85_vm2, %v68_v41 }
  0x1b   :  { %3787 = vmatprep.mubr.msk.bf16.mxu0 %vm85_vm2, %v260_v42 }
  0x20   :  { %3788 = vmatmul.mubr.msk.bf16.gmra.mxu0 %vm85_vm2, %v261_v52 }
  0x21   :  { %3778 = vmatmul.mubr.msk.bf16.gmra.mxu1 %vm85_vm2, %v69_v51  ;;  %3803 = vmatprep.mubr.msk.bf16.mxu0 %vm85_vm2, %v462_v54 }
  0x22   :  { %3793 = vmatprep.mubr.msk.bf16.mxu1 %vm85_vm2, %v360_v53 }
  0x28   :  { %3804 = vmatmul.mubr.msk.bf16.vlgmr.msra.gmra.mxu0 %vm85_vm2, %v463_v0 }
  0x29   :  { %3794 = vmatmul.mubr.msk.bf16.vlgmr.msra.gmra.mxu1 %vm85_vm2, %v361_v63  ;;  %3807 = vmatprep.mubr.msk.bf16.mxu0 %vm85_vm2, %v464_v2 }
  0x2a   :  { %3797 = vmatprep.mubr.msk.bf16.mxu1 %vm85_vm2, %v362_v1 }
  0x30   :  { %3808 = vmatmul.mubr.msk.bf16.gmra.mxu0 %vm85_vm2, %v465_v8 }
  0x31   :  { %3798 = vmatmul.mubr.msk.bf16.gmra.mxu1 %vm85_vm2, %v363_v7 }
  0x32   :  { %22 = vsyncpa [#allocation4], 0  ;;  %v3938_v9 = vld [vmem:[%s5117_s4 + $0x78] sm:$0xff]   ;;  %v3942_v13 = vld [vmem:[%s5117_s4 + $0x70] sm:$0xff]   ;;  %v4110_v33 = vmov 0.0   ;;  %v606_v7 = vlaneseq  ;;  %vm1028_vm3 = vcmask 1041409  }
  0x33   :  { %3562 = vmatprep.subr.bf16.mxu1 %v3938_v9  ;;  %v3939_v10 = vld [vmem:[%s5117_s4 + $0x38] sm:$0xff]   ;;  %v3943_v14 = vld [vmem:[%s5117_s4 + $0x30] sm:$0xff]   ;;  %v3946_v17 = vld [vmem:[%s5117_s4 + $0x68] sm:$0xff]   ;;  %994 = vst [vmem:[#allocation2] sm:$0x3] %v4110_v33  ;;  %vm1030_vm4 = vcmask 1042434  }
  0x34   :  { %v3940_v11 = vld [vmem:[%s5117_s4 + $0xf8] sm:$0xff]   ;;  %3563 = vmatpush3.bf16.msra.mxu1 %v3939_v10  ;;  %v3944_v15 = vld [vmem:[%s5117_s4 + $0xf0] sm:$0xff]   ;;  %v3947_v18 = vld [vmem:[%s5117_s4 + $0x28] sm:$0xff]   ;;  %995 = vst [vmem:[#allocation2 + $0x18] sm:$0x3] %v4110_v33  ;;  %vm1032_vm5 = vcmask 1043459  }
  0x35   :  { %v3941_v12 = vld [vmem:[%s5117_s4 + $0xb8] sm:$0xff]   ;;  %3590 = vmatprep.subr.bf16.mxu0 %v3940_v11  ;;  %3564 = vmatprep.subr.bf16.mxu1 %v3942_v13  ;;  %v3945_v16 = vld [vmem:[%s5117_s4 + $0xb0] sm:$0xff]   ;;  %v3948_v19 = vld [vmem:[%s5117_s4 + $0xe8] sm:$0xff]   ;;  %1071 = vst [vmem:[#allocation2 + $0x12] sm:$0x3] %v4110_v33  ;;  %vm1034_vm6 = vcmask 1044484  }
  0x36   :  { %3591 = vmatpush3.bf16.msra.mxu0 %v3941_v12  ;;  %v3949_v20 = vld [vmem:[%s5117_s4 + $0xa8] sm:$0xff]   ;;  %v3950_v21 = vld [vmem:[%s5117_s4 + $0x60] sm:$0xff]   ;;  %v3954_v25 = vld [vmem:[%s5117_s4 + $0x58] sm:$0xff]   ;;  %1072 = vst [vmem:[#allocation2 + $0x2a] sm:$0x3] %v4110_v33  ;;  %vm1036_vm7 = vcmask 1045509  }
  0x37   :  { %3592 = vmatprep.subr.bf16.mxu0 %v3944_v15  ;;  %v3951_v22 = vld [vmem:[%s5117_s4 + $0x20] sm:$0xff]   ;;  %v3955_v26 = vld [vmem:[%s5117_s4 + $0x18] sm:$0xff]   ;;  %v3958_v29 = vld [vmem:[%s5117_s4 + $0x50] sm:$0xff]   ;;  %v4111_v5 = vmov 1983009808   ;;  %vm1038_vm8 = vcmask 1046534  }
  0x38   :  { %3565 = vmatpush3.bf16.msra.mxu1 %v3943_v14  ;;  %v3952_v23 = vld [vmem:[%s5117_s4 + $0xe0] sm:$0xff]   ;;  %v3956_v27 = vld [vmem:[%s5117_s4 + $0xd8] sm:$0xff]   ;;  %v3959_v30 = vld [vmem:[%s5117_s4 + $0x10] sm:$0xff]   ;;  %v604_v6 = vunpack.c.l.s4 %v4111_v5  ;;  %vm1040_vm9 = vcmask 1047559   ;;  %vm4112_vm10 = vmmov 0  }
  0x39   :  { %3566 = vmatprep.subr.bf16.mxu1 %v3946_v17  ;;  %v3953_v24 = vld [vmem:[%s5117_s4 + $0xa0] sm:$0xff]   ;;  %v3957_v28 = vld [vmem:[%s5117_s4 + $0x98] sm:$0xff]   ;;  %v3960_v31 = vld [vmem:[%s5117_s4 + $0xd0] sm:$0xff]   ;;  %v607_v17 = vshrl.u32 %v606_v7, 7 }
  0x3a   :  { %3593 = vmatpush3.bf16.msra.mxu0 %v3945_v16  ;;  %v3961_v32 = vld [vmem:[%s5117_s4 + $0x90] sm:$0xff]   ;;  %v3962_v34 = vld [vmem:[%s5117_s4 + $0x48] sm:$0xff]   ;;  %v3966_v38 = vld [vmem:[%s5117_s4 + $0x40] sm:$0xff]   ;;  %v605_v16 = vunpack.c.0.s8 %v604_v6 }
  0x3b   :  { %3594 = vmatprep.subr.bf16.mxu0 %v3948_v19  ;;  %v3963_v35 = vld [vmem:[%s5117_s4 + $0x8] sm:$0xff]   ;;  %v3967_v39 = vld [vmem:[%s5117_s4] sm:$0xff]   ;;  %v4463_v42 = vld [vmem:[%s5117_s4 + $0x138] sm:$0xff]  }
  0x3c   :  { %3567 = vmatpush3.bf16.msra.mxu1 %v3947_v18  ;;  %v3964_v36 = vld [vmem:[%s5117_s4 + $0xc8] sm:$0xff]   ;;  %v3968_v40 = vld [vmem:[%s5117_s4 + $0xc0] sm:$0xff]  }
  0x3d   :  { %3568 = vmatprep.subr.bf16.mxu1 %v3950_v21  ;;  %v3965_v37 = vld [vmem:[%s5117_s4 + $0x88] sm:$0xff]   ;;  %v3969_v41 = vld [vmem:[%s5117_s4 + $0x80] sm:$0xff]  }
  0x3e   :  { %3595 = vmatpush3.bf16.msra.mxu0 %v3949_v20  ;;  %v4473_v15 = vld [vmem:[%s5115_s2] ss:$0 sm:$0xff] }
  0x3f   :  { %3596 = vmatprep.subr.bf16.mxu0 %v3952_v23 }
  0x40   :  { %3569 = vmatpush3.bf16.msra.mxu1 %v3951_v22 }
  0x41   :  { %3570 = vmatprep.subr.bf16.mxu1 %v3954_v25 }
  0x42   :  { %3597 = vmatpush3.bf16.msra.mxu0 %v3953_v24  ;;  %v4478_v24 = vld [vmem:[%s5116_s3] ss:$0 sm:$0xff] }
  0x43   :  { %3598 = vmatprep.subr.bf16.mxu0 %v3956_v27 }
  0x44   :  { %3571 = vmatpush3.bf16.msra.mxu1 %v3955_v26 }
  0x45   :  { %3572 = vmatprep.subr.bf16.mxu1 %v3958_v29 }
  0x46   :  { %3599 = vmatpush3.bf16.msra.mxu0 %v3957_v28 }
  0x47   :  { %3600 = vmatprep.subr.bf16.mxu0 %v3960_v31 }
  0x48   :  { %3573 = vmatpush3.bf16.msra.mxu1 %v3959_v30 }
  0x49   :  { %3574 = vmatprep.subr.bf16.mxu1 %v3962_v34 }
  0x4a   :  { %3601 = vmatpush3.bf16.msra.mxu0 %v3961_v32  ;;  %v4481_v32 = vsub.s32 %v605_v16, %v607_v17 }
  0x4b   :  { %3602 = vmatprep.subr.bf16.mxu0 %v3964_v36 }
  0x4c   :  { %3575 = vmatpush3.bf16.msra.mxu1 %v3963_v35 }
  0x4d   :  { %3576 = vmatprep.subr.bf16.mxu1 %v3966_v38 }
  0x4e   :  { %3603 = vmatpush3.bf16.msra.mxu0 %v3965_v37 }
  0x4f   :  { %3604 = vmatprep.subr.bf16.mxu0 %v3968_v40 }
  0x50   :  { %3577 = vmatpush3.bf16.msra.mxu1 %v3967_v39 }
  0x51   :  { %3811 = vmatprep.subr.bf16.mxu1 %v4463_v42 }
  0x52   :  { %3605 = vmatpush3.bf16.msra.mxu0 %v3969_v41 }
  0xd0   :  { %v3765_v43 = vpop.f32.mrf.mxu0 }
  0xd1   :  { %v3769_v44 = vpop.f32.mrf.mxu1 }
  0xd2   :  { %v139_v45 = vpop.f32.mrf.mxu0 }
  0xd3   :  { %v155_v46 = vpop.f32.mrf.mxu1 }
  0xd4   :  { %v3766_v47 = vpop.f32.mrf.mxu0 }
  0xd5   :  { %v3770_v48 = vpop.f32.mrf.mxu1 }
  0xd6   :  { %v142_v49 = vpop.f32.mrf.mxu0 }
  0xd7   :  { %v4466_v50 = vpop.f32.mrf.mxu1 }
  0xd8   :  { %v3785_v52 = vpop.f32.mrf.mxu0 }
  0xd9   :  { %v3775_v51 = vpop.f32.mrf.mxu1 }
  0xda   :  { %v313_v54 = vpop.f32.mrf.mxu0  ;;  %v228_v63 = vadd.f32 %v3775_v51, %v3765_v43 }
  0xdb   :  { %v219_v53 = vpop.f32.mrf.mxu1 }
  0xdc   :  { %v3786_v56 = vpop.f32.mrf.mxu0  ;;  %v220_v2 = vadd.f32 %v219_v53, %v139_v45  ;;  %v346_v8 = vadd.f32 %v3785_v52, %v228_v63 }
  0xdd   :  { %v3776_v55 = vpop.f32.mrf.mxu1 }
  0xde   :  { %v316_v58 = vpop.f32.mrf.mxu0  ;;  %v231_v9 = vadd.f32 %v3776_v55, %v3766_v47  ;;  %v344_v12 = vadd.f32 %v313_v54, %v220_v2 }
  0xdf   :  { %v222_v57 = vpop.f32.mrf.mxu1 }
  0xe0   :  { %v3789_v60 = vpop.f32.mrf.mxu0  ;;  %v223_v13 = vadd.f32 %v222_v57, %v142_v49  ;;  %v347_v20 = vadd.f32 %v3786_v56, %v231_v9 }
  0xe1   :  { %v3779_v59 = vpop.f32.mrf.mxu1 }
  0xe2   :  { %v329_v62 = vpop.f32.mrf.mxu0  ;;  %v244_v23 = vadd.f32 %v3779_v59, %v3769_v44  ;;  %v345_v27 = vadd.f32 %v316_v58, %v223_v13 }
  0xe3   :  { %v235_v61 = vpop.f32.mrf.mxu1 }
  0xe4   :  { %v3790_v1 = vpop.f32.mrf.mxu0  ;;  %v236_v31 = vadd.f32 %v235_v61, %v155_v46  ;;  %v350_v39 = vadd.f32 %v3789_v60, %v244_v23 }
  0xe5   :  { %v3780_v0 = vpop.f32.mrf.mxu1 }
  0xe6   :  { %v4468_v4 = vpop.f32.mrf.mxu0  ;;  %v247_v40 = vadd.f32 %v3780_v0, %v3770_v48  ;;  %v348_v46 = vadd.f32 %v329_v62, %v236_v31 }
  0xe7   :  { %v238_v3 = vpop.f32.mrf.mxu1 }
  0xe8   :  { %v3805_v11 = vpop.f32.mrf.mxu0  ;;  %v4489_v58 = vadd.f32 %v3790_v1, %v247_v40  ;;  %v4492_v48 = vadd.f32 %v238_v3, %v4466_v50 }
  0xe9   :  { %v3795_v10 = vpop.f32.mrf.mxu1 }
  0xea   :  { %v448_v14 = vadd.f32 %v3795_v10, %v346_v8  ;;  %v517_v19 = vpop.f32.mrf.mxu0 }
  0xeb   :  { %v415_v18 = vpop.f32.mrf.mxu1 }
  0xec   :  { %v550_v21 = vadd.f32 %v3805_v11, %v448_v14  ;;  %v446_v22 = vadd.f32 %v415_v18, %v344_v12  ;;  %v3806_v26 = vpop.f32.mrf.mxu0 }
  0xed   :  { %v3796_v25 = vpop.f32.mrf.mxu1 }
  0xee   :  { %v565_v28 = vmul.f32 %v4473_v15, %v550_v21  ;;  %v548_v29 = vadd.f32 %v517_v19, %v446_v22  ;;  %v449_v30 = vadd.f32 %v3796_v25, %v347_v20  ;;  %v520_v41 = vpop.f32.mrf.mxu0 }
  0xef   :  { %v418_v34 = vpop.f32.mrf.mxu1 }
  0xf0   :  { %v580_v35 = vadd.f32 %v4478_v24, %v565_v28  ;;  %v563_v36 = vmul.f32 %v4473_v15, %v548_v29  ;;  %v551_v37 = vadd.f32 %v3806_v26, %v449_v30  ;;  %v447_v38 = vadd.f32 %v418_v34, %v345_v27  ;;  %v3809_v57 = vpop.f32.mrf.mxu0 }
  0xf1   :  { %v3799_v43 = vpop.f32.mrf.mxu1 }
  0xf2   :  { %v588_v44 = vmax.f32 %v580_v35, 0.0  ;;  %v578_v45 = vadd.f32 %v4478_v24, %v563_v36  ;;  %v566_v47 = vmul.f32 %v4473_v15, %v551_v37  ;;  %v549_v49 = vadd.f32 %v520_v41, %v447_v38 }
  0xf3   :  { %v452_v51 = vadd.f32 %v3799_v43, %v350_v39  ;;  %v431_v52 = vpop.f32.mrf.mxu1 }
  0xf4   :  { %v636_v53 = vcombine.high %v588_v44, %v588_v44  ;;  %v643_v54 = vrot.slane %v588_v44, %v4481_v32  ;;  %v586_v55 = vmax.f32 %v578_v45, 0.0  ;;  %v581_v56 = vadd.f32 %v4478_v24, %v566_v47 }
  0xf5   :  { %v4495_v59 = vmul.f32 %v4473_v15, %v549_v49  ;;  %v4497_v60 = vadd.f32 %v431_v52, %v348_v46  ;;  %v4502_v1 = vadd.f32 %v3809_v57, %v452_v51 }
  0xf6   :  { %v650_v61 = vrot.slane %v636_v53, %v4481_v32  ;;  %v651_v62 = vcombine.high %v643_v54, %v643_v54  ;;  %v826_v63 = vsel %vm99_vm1, %v643_v54, -inf  ;;  %v602_v0 = vcombine.high %v586_v55, %v586_v55 }
  0xf7   :  { %v827_v2 = vrot.slane %v826_v63, 4  ;;  %v609_v5 = vrot.slane %v586_v55, %v4481_v32  ;;  %v589_v6 = vmax.f32 %v581_v56, 0.0 }
  0xf8   :  { %v652_v7 = vcombine.high %v650_v61, %v650_v61  ;;  %v833_v50 = vsel %vm99_vm1, %v651_v62, -inf  ;;  %v840_v3 = vsel %vm99_vm1, %v650_v61, -inf  ;;  %v616_v8 = vrot.slane %v602_v0, %v4481_v32 }
  0xf9   :  { %v828_v9 = vmax.f32 %v826_v63, %v827_v2  ;;  %v834_v10 = vrot.slane %v833_v50, 4  ;;  %v841_v11 = vrot.slane %v840_v3, 4  ;;  %v617_v12 = vcombine.high %v609_v5, %v609_v5 }
  0xfa   :  { %v847_v13 = vsel %vm99_vm1, %v652_v7, -inf  ;;  %v618_v14 = vcombine.high %v616_v8, %v616_v8  ;;  %v770_v16 = vsel %vm99_vm1, %v609_v5, -inf  ;;  %v784_v17 = vsel %vm99_vm1, %v616_v8, -inf }
  0xfb   :  { %v829_v18 = vrot.slane %v828_v9, 2  ;;  %v835_v19 = vmax.f32 %v833_v50, %v834_v10  ;;  %v842_v20 = vmax.f32 %v840_v3, %v841_v11  ;;  %v848_v21 = vrot.slane %v847_v13, 4 }
  0xfc   :  { %v771_v22 = vrot.slane %v770_v16, 4  ;;  %v777_v23 = vsel %vm99_vm1, %v617_v12, -inf  ;;  %v785_v25 = vrot.slane %v784_v17, 4  ;;  %v791_v26 = vsel %vm99_vm1, %v618_v14, -inf }
  0xfd   :  { %v830_v27 = vmax.f32 %v828_v9, %v829_v18  ;;  %v836_v28 = vrot.slane %v835_v19, 2  ;;  %v843_v29 = vrot.slane %v842_v20, 2  ;;  %v849_v30 = vmax.f32 %v847_v13, %v848_v21 }
  0xfe   :  { %v772_v31 = vmax.f32 %v770_v16, %v771_v22  ;;  %v778_v34 = vrot.slane %v777_v23, 4  ;;  %v786_v35 = vmax.f32 %v784_v17, %v785_v25  ;;  %v792_v36 = vrot.slane %v791_v26, 4 }
  0xff   :  { %v831_v37 = vrot.slane %v830_v27, 1  ;;  %v837_v38 = vmax.f32 %v835_v19, %v836_v28  ;;  %v844_v39 = vmax.f32 %v842_v20, %v843_v29  ;;  %v850_v40 = vrot.slane %v849_v30, 2 }
 0x100   :  { %v773_v41 = vrot.slane %v772_v31, 2  ;;  %v779_v43 = vmax.f32 %v777_v23, %v778_v34  ;;  %v787_v44 = vrot.slane %v786_v35, 2  ;;  %v793_v45 = vmax.f32 %v791_v26, %v792_v36 }
 0x101   :  { %v832_v47 = vmax.f32 %v830_v27, %v831_v37  ;;  %v838_v49 = vrot.slane %v837_v38, 1  ;;  %v845_v46 = vrot.slane %v844_v39, 1  ;;  %v851_v51 = vmax.f32 %v849_v30, %v850_v40 }
 0x102   :  { %v774_v52 = vmax.f32 %v772_v31, %v773_v41  ;;  %v780_v53 = vrot.slane %v779_v43, 2  ;;  %v788_v54 = vmax.f32 %v786_v35, %v787_v44  ;;  %v794_v55 = vrot.slane %v793_v45, 2 }
 0x103   :  { %v839_v56 = vmax.f32 %v837_v38, %v838_v49  ;;  %v846_v57 = vmax.f32 %v844_v39, %v845_v46  ;;  %v852_v61 = vrot.slane %v851_v51, 1  ;;  %v653_v62 = vcombine.high %v589_v6, %v589_v6 }
 0x104   :  { %v775_v63 = vrot.slane %v774_v52, 1  ;;  %v781_v0 = vmax.f32 %v779_v43, %v780_v53  ;;  %v789_v2 = vrot.slane %v788_v54, 1  ;;  %v795_v5 = vmax.f32 %v793_v45, %v794_v55 }
 0x105   :  { %v1042_v7 = vsel %vm1028_vm3, %v839_v56, %v832_v47  ;;  %v660_v50 = vrot.slane %v589_v6, %v4481_v32  ;;  %v667_v3 = vrot.slane %v653_v62, %v4481_v32  ;;  %v579_v8 = vadd.f32 %v4478_v24, %v4495_v59 }
 0x106   :  { %v853_v9 = vmax.f32 %v851_v51, %v852_v61  ;;  %v1043_v10 = vsel %vm1030_vm4, %v846_v57, %v1042_v7  ;;  %v782_v11 = vrot.slane %v781_v0, 1  ;;  %v790_v12 = vmax.f32 %v788_v54, %v789_v2 }
 0x107   :  { %v796_v13 = vrot.slane %v795_v5, 1  ;;  %v668_v14 = vcombine.high %v660_v50, %v660_v50  ;;  %v669_v16 = vcombine.high %v667_v3, %v667_v3  ;;  %v854_v17 = vsel %vm99_vm1, %v660_v50, -inf }
 0x108   :  { %v776_v18 = vmax.f32 %v774_v52, %v775_v63  ;;  %v783_v19 = vmax.f32 %v781_v0, %v782_v11  ;;  %v855_v20 = vrot.slane %v854_v17, 4  ;;  %v868_v6 = vsel %vm99_vm1, %v667_v3, -inf  ;;  %v533_v11 = vpop.f32.mrf.mxu0 }
 0x109   :  { %v797_v21 = vmax.f32 %v795_v5, %v796_v13  ;;  %v861_v22 = vsel %vm99_vm1, %v668_v14, -inf  ;;  %v869_v23 = vrot.slane %v868_v6, 4  ;;  %v875_v59 = vsel %vm99_vm1, %v669_v16, -inf }
 0x10a   :  { %v1029_v25 = vsel %vm1028_vm3, %v783_v19, %v776_v18  ;;  %v856_v26 = vmax.f32 %v854_v17, %v855_v20  ;;  %v862_v27 = vrot.slane %v861_v22, 4  ;;  %v876_v28 = vrot.slane %v875_v59, 4 }
 0x10b   :  { %v1031_v29 = vsel %vm1030_vm4, %v790_v12, %v1029_v25  ;;  %v870_v30 = vmax.f32 %v868_v6, %v869_v23  ;;  %v587_v31 = vmax.f32 %v579_v8, 0.0  ;;  %v569_v34 = vmul.f32 %v4473_v15, %v4502_v1 }
 0x10c   :  { %v857_v35 = vrot.slane %v856_v26, 2  ;;  %v863_v36 = vmax.f32 %v861_v22, %v862_v27  ;;  %v877_v37 = vmax.f32 %v875_v59, %v876_v28  ;;  %v1044_v38 = vsel %vm1032_vm5, %v853_v9, %v1043_v10  ;;  %v3800_v10 = vpop.f32.mrf.mxu1 }
 0x10d   :  { %v871_v39 = vrot.slane %v870_v30, 2  ;;  %v619_v40 = vcombine.high %v587_v31, %v587_v31  ;;  %v626_v41 = vrot.slane %v587_v31, %v4481_v32  ;;  %v1033_v43 = vsel %vm1032_vm5, %v797_v21, %v1031_v29 }
 0x10e   :  { %v858_v44 = vmax.f32 %v856_v26, %v857_v35  ;;  %v864_v45 = vrot.slane %v863_v36, 2  ;;  %v878_v47 = vrot.slane %v877_v37, 2  ;;  %v584_v49 = vadd.f32 %v4478_v24, %v569_v34 }
 0x10f   :  { %v872_v46 = vmax.f32 %v870_v30, %v871_v39  ;;  %v633_v1 = vrot.slane %v619_v40, %v4481_v32  ;;  %v634_v51 = vcombine.high %v626_v41, %v626_v41  ;;  %v798_v52 = vsel %vm99_vm1, %v626_v41, -inf }
 0x110   :  { %v859_v53 = vrot.slane %v858_v44, 1  ;;  %v865_v54 = vmax.f32 %v863_v36, %v864_v45  ;;  %v879_v55 = vmax.f32 %v877_v37, %v878_v47  ;;  %v799_v56 = vrot.slane %v798_v52, 4 }
 0x111   :  { %v873_v57 = vrot.slane %v872_v46, 1  ;;  %v635_v61 = vcombine.high %v633_v1, %v633_v1  ;;  %v805_v62 = vsel %vm99_vm1, %v634_v51, -inf  ;;  %v812_v63 = vsel %vm99_vm1, %v633_v1, -inf }
 0x112   :  { %v860_v0 = vmax.f32 %v858_v44, %v859_v53  ;;  %v866_v2 = vrot.slane %v865_v54, 1  ;;  %v880_v5 = vrot.slane %v879_v55, 1  ;;  %v800_v7 = vmax.f32 %v798_v52, %v799_v56 }
 0x113   :  { %v874_v50 = vmax.f32 %v872_v46, %v873_v57  ;;  %v806_v3 = vrot.slane %v805_v62, 4  ;;  %v813_v8 = vrot.slane %v812_v63, 4  ;;  %v819_v9 = vsel %vm99_vm1, %v635_v61, -inf }
 0x114   :  { %v867_v12 = vmax.f32 %v865_v54, %v866_v2  ;;  %v881_v13 = vmax.f32 %v879_v55, %v880_v5  ;;  %v1045_v14 = vsel %vm1034_vm6, %v860_v0, %v1044_v38  ;;  %v801_v16 = vrot.slane %v800_v7, 2 }
 0x115   :  { %v807_v17 = vmax.f32 %v805_v62, %v806_v3  ;;  %v814_v18 = vmax.f32 %v812_v63, %v813_v8  ;;  %v820_v19 = vrot.slane %v819_v9, 4  ;;  %v592_v20 = vmax.f32 %v584_v49, 0.0  ;;  %v3810_v62 = vpop.f32.mrf.mxu0 }
 0x116   :  { %v1046_v6 = vsel %vm1036_vm7, %v867_v12, %v1045_v14  ;;  %v802_v21 = vmax.f32 %v800_v7, %v801_v16  ;;  %v453_v22 = vadd.f32 %v3800_v10, %v4489_v58  ;;  %v552_v23 = vadd.f32 %v533_v11, %v4497_v60 }
 0x117   :  { %v1047_v59 = vsel %vm1038_vm8, %v874_v50, %v1046_v6  ;;  %v808_v25 = vrot.slane %v807_v17, 2  ;;  %v815_v26 = vrot.slane %v814_v18, 2  ;;  %v821_v27 = vmax.f32 %v819_v9, %v820_v19 }
 0x118   :  { %v4541_v28 = vsel %vm1040_vm9, %v881_v13, %v1047_v59  ;;  %v803_v29 = vrot.slane %v802_v21, 1  ;;  %v704_v30 = vcombine.high %v592_v20, %v592_v20  ;;  %v711_v31 = vrot.slane %v592_v20, %v4481_v32 }
 0x119   :  { %1068 = vst [vmem:[#allocation2 + $0xa] sm:$0xff] %v4541_v28  ;;  %v809_v34 = vmax.f32 %v807_v17, %v808_v25  ;;  %v816_v35 = vmax.f32 %v814_v18, %v815_v26  ;;  %v822_v36 = vrot.slane %v821_v27, 2  ;;  %v567_v58 = vmul.f32 %v4473_v15, %v552_v23  ;;  %v434_v25 = vpop.f32.mrf.mxu1 }
 0x11a   :  { %v804_v60 = vmax.f32 %v802_v21, %v803_v29  ;;  %v718_v37 = vrot.slane %v704_v30, %v4481_v32  ;;  %v719_v38 = vcombine.high %v711_v31, %v711_v31  ;;  %v938_v39 = vsel %vm99_vm1, %v711_v31, -inf }
 0x11b   :  { %v810_v40 = vrot.slane %v809_v34, 1  ;;  %v817_v41 = vrot.slane %v816_v35, 1  ;;  %v823_v44 = vmax.f32 %v821_v27, %v822_v36  ;;  %v939_v45 = vrot.slane %v938_v39, 4 }
 0x11c   :  { %v1035_v47 = vsel %vm1034_vm6, %v804_v60, %v1033_v43  ;;  %v720_v49 = vcombine.high %v718_v37, %v718_v37  ;;  %v945_v46 = vsel %vm99_vm1, %v719_v38, -inf  ;;  %v952_v1 = vsel %vm99_vm1, %v718_v37, -inf }
 0x11d   :  { %v811_v51 = vmax.f32 %v809_v34, %v810_v40  ;;  %v818_v52 = vmax.f32 %v816_v35, %v817_v41  ;;  %v824_v53 = vrot.slane %v823_v44, 1  ;;  %v940_v54 = vmax.f32 %v938_v39, %v939_v45 }
 0x11e   :  { %v946_v55 = vrot.slane %v945_v46, 4  ;;  %v953_v56 = vrot.slane %v952_v1, 4  ;;  %v959_v57 = vsel %vm99_vm1, %v720_v49, -inf  ;;  %v582_v61 = vadd.f32 %v4478_v24, %v567_v58 }
 0x11f   :  { %v825_v63 = vmax.f32 %v823_v44, %v824_v53  ;;  %v1037_v0 = vsel %vm1036_vm7, %v811_v51, %v1035_v47  ;;  %v941_v43 = vrot.slane %v940_v54, 2  ;;  %v960_v2 = vrot.slane %v959_v57, 4 }
 0x120   :  { %v1039_v5 = vsel %vm1038_vm8, %v818_v52, %v1037_v0  ;;  %v947_v7 = vmax.f32 %v945_v46, %v946_v55  ;;  %v954_v50 = vmax.f32 %v952_v1, %v953_v56  ;;  %v590_v3 = vmax.f32 %v582_v61, 0.0  ;;  %v4571_v45 = vld [vmem:[#allocation2 + $0xb] sm:$0xff]  ;;  %v536_v61 = vpop.f32.mrf.mxu0 }
 0x121   :  { %v4556_v8 = vsel %vm1040_vm9, %v825_v63, %v1039_v5  ;;  %v942_v9 = vmax.f32 %v940_v54, %v941_v43  ;;  %v961_v10 = vmax.f32 %v959_v57, %v960_v2  ;;  %v555_v11 = vadd.f32 %v3810_v62, %v453_v22 }
 0x122   :  { %1067 = vst [vmem:[#allocation2 + $0x2] sm:$0xff] %v4556_v8  ;;  %v948_v12 = vrot.slane %v947_v7, 2  ;;  %v955_v13 = vrot.slane %v954_v50, 2  ;;  %v670_v14 = vcombine.high %v590_v3, %v590_v3  ;;  %v677_v16 = vrot.slane %v590_v3, %v4481_v32 }
 0x123   :  { %v962_v17 = vrot.slane %v961_v10, 2  ;;  %v570_v18 = vmul.f32 %v4473_v15, %v555_v11  ;;  %v349_v23 = vadd.f32 %v4468_v4, %v4492_v48  ;;  %v943_v59 = vrot.slane %v942_v9, 1 }
 0x124   :  { %v949_v19 = vmax.f32 %v947_v7, %v948_v12  ;;  %v956_v20 = vmax.f32 %v954_v50, %v955_v13  ;;  %v684_v6 = vrot.slane %v670_v14, %v4481_v32  ;;  %v685_v21 = vcombine.high %v677_v16, %v677_v16 }
 0x125   :  { %v882_v22 = vsel %vm99_vm1, %v677_v16, -inf  ;;  %v585_v26 = vadd.f32 %v4478_v24, %v570_v18  ;;  %v963_v29 = vmax.f32 %v961_v10, %v962_v17  ;;  %v451_v4 = vadd.f32 %v434_v25, %v349_v23 }
 0x126   :  { %v950_v27 = vrot.slane %v949_v19, 1  ;;  %v686_v30 = vcombine.high %v684_v6, %v684_v6  ;;  %v883_v31 = vrot.slane %v882_v22, 4  ;;  %v957_v34 = vrot.slane %v956_v20, 1 }
 0x127   :  { %v889_v35 = vsel %vm99_vm1, %v685_v21, -inf  ;;  %v896_v36 = vsel %vm99_vm1, %v684_v6, -inf  ;;  %v593_v58 = vmax.f32 %v585_v26, 0.0  ;;  %v944_v48 = vmax.f32 %v942_v9, %v943_v59 }
 0x128   :  { %v951_v60 = vmax.f32 %v949_v19, %v950_v27  ;;  %v884_v37 = vmax.f32 %v882_v22, %v883_v31  ;;  %v890_v38 = vrot.slane %v889_v35, 4  ;;  %v897_v39 = vrot.slane %v896_v36, 4 }
 0x129   :  { %v903_v40 = vsel %vm99_vm1, %v686_v30, -inf  ;;  %v721_v41 = vcombine.high %v593_v58, %v593_v58  ;;  %v4569_v44 = vld [vmem:[#allocation2 + $0x9] sm:$0xff]  ;;  %v964_v47 = vrot.slane %v963_v29, 1  ;;  %v958_v54 = vmax.f32 %v956_v20, %v957_v34  ;;  %v1077_v34 = vld [vmem:[#allocation2 + $0x1] sm:$0xff] }
 0x12a   :  { %v885_v49 = vrot.slane %v884_v37, 2  ;;  %v891_v46 = vmax.f32 %v889_v35, %v890_v38  ;;  %v904_v1 = vrot.slane %v903_v40, 4  ;;  %v4573_v51 = vld [vmem:[#allocation2 + $0x3] sm:$0xff]  ;;  %v898_v55 = vmax.f32 %v896_v36, %v897_v39 }
 0x12b   :  { %v4575_v52 = vld [vmem:[#allocation2 + $0x8] sm:$0xff]  ;;  %v728_v56 = vrot.slane %v593_v58, %v4481_v32  ;;  %v735_v57 = vrot.slane %v721_v41, %v4481_v32  ;;  %v1056_v62 = vsel %vm1028_vm3, %v951_v60, %v944_v48  ;;  %v553_v11 = vadd.f32 %v536_v61, %v451_v4  ;;  %v1073_v39 = vld [vmem:[#allocation2] sm:$0xff]  ;;  %v3971_v61 = vld [vmem:[%s5117_s4 + $0x130] sm:$0xff]  }
 0x12c   :  { %v4577_v53 = vld [vmem:[#allocation2 + $0x4] sm:$0xff]  ;;  %v886_v63 = vmax.f32 %v884_v37, %v885_v49  ;;  %v892_v0 = vrot.slane %v891_v46, 2  ;;  %v905_v43 = vmax.f32 %v903_v40, %v904_v1  ;;  %v899_v2 = vrot.slane %v898_v55, 2 }
 0x12d   :  { %1830 = vst [vmem:[#allocation2 + $0xa] sm:$0x3] %v4110_v33  ;;  %v736_v5 = vcombine.high %v728_v56, %v728_v56  ;;  %v737_v7 = vcombine.high %v735_v57, %v735_v57  ;;  %v966_v50 = vsel %vm99_vm1, %v728_v56, -inf  ;;  %v965_v12 = vmax.f32 %v963_v29, %v964_v47 }
 0x12e   :  { %v893_v3 = vmax.f32 %v891_v46, %v892_v0  ;;  %v906_v9 = vrot.slane %v905_v43, 2  ;;  %v967_v10 = vrot.slane %v966_v50, 4  ;;  %v980_v14 = vsel %vm99_vm1, %v735_v57, -inf }
 0x12f   :  { %v973_v13 = vsel %vm99_vm1, %v736_v5, -inf  ;;  %v987_v16 = vsel %vm99_vm1, %v737_v7, -inf  ;;  %v1057_v17 = vsel %vm1030_vm4, %v958_v54, %v1056_v62  ;;  %v887_v18 = vrot.slane %v886_v63, 1 }
 0x130   :  { %v900_v19 = vmax.f32 %v898_v55, %v899_v2  ;;  %v968_v20 = vmax.f32 %v966_v50, %v967_v10  ;;  %v894_v6 = vrot.slane %v893_v3, 1  ;;  %v974_v21 = vrot.slane %v973_v13, 4 }
 0x131   :  { %v981_v23 = vrot.slane %v980_v14, 4  ;;  %v988_v59 = vrot.slane %v987_v16, 4  ;;  %v4588_v22 = vmax.f32 %v905_v43, %v906_v9  ;;  %v568_v26 = vmul.f32 %v4473_v15, %v553_v11 }
 0x132   :  { %v969_v25 = vrot.slane %v968_v20, 2  ;;  %v975_v27 = vmax.f32 %v973_v13, %v974_v21  ;;  %v1058_v31 = vsel %vm1032_vm5, %v965_v12, %v1057_v17  ;;  %v888_v35 = vmax.f32 %v886_v63, %v887_v18 }
 0x133   :  { %v982_v29 = vmax.f32 %v980_v14, %v981_v23  ;;  %v989_v30 = vmax.f32 %v987_v16, %v988_v59  ;;  %v901_v36 = vrot.slane %v900_v19, 1  ;;  %v583_v60 = vadd.f32 %v4478_v24, %v568_v26  ;;  %v3973_v59 = vld [vmem:[%s5117_s4 + $0x120] sm:$0xff]  }
 0x134   :  { %v970_v58 = vmax.f32 %v968_v20, %v969_v25  ;;  %v895_v37 = vmax.f32 %v893_v3, %v894_v6  ;;  %v976_v38 = vrot.slane %v975_v27, 2  ;;  %v908_v40 = vrot.slane %v4588_v22, 1 }
 0x135   :  { %v983_v4 = vrot.slane %v982_v29, 2  ;;  %v990_v48 = vrot.slane %v989_v30, 2  ;;  %v591_v15 = vmax.f32 %v583_v60, 0.0  ;;  %v1094_v47 = vpack.c.bf16 %v4569_v44, %v1077_v34 }
 0x136   :  { %v971_v41 = vrot.slane %v970_v58, 1  ;;  %v977_v49 = vmax.f32 %v975_v27, %v976_v38  ;;  %v1096_v54 = vpack.c.bf16 %v4571_v45, %v4573_v51  ;;  %v1093_v57 = vpack.c.bf16 %v4575_v52, %v1073_v39 }
 0x137   :  { %v984_v46 = vmax.f32 %v982_v29, %v983_v4  ;;  %v991_v1 = vmax.f32 %v989_v30, %v990_v48  ;;  %v687_v56 = vcombine.high %v591_v15, %v591_v15  ;;  %v694_v24 = vrot.slane %v591_v15, %v4481_v32  ;;  %1455 = vmatprep.mubr.bf16.mxu1 %v1094_v47  ;;  %v3975_v15 = vld [vmem:[%s5117_s4 + $0x110] sm:$0xff]  }
 0x138   :  { %v972_v55 = vmax.f32 %v970_v58, %v971_v41  ;;  %v978_v62 = vrot.slane %v977_v49, 1  ;;  %1504 = vmatprep.mubr.bf16.mxu0 %v1096_v54  ;;  %v1095_v0 = vpack.c.bf16 %v4541_v28, %v4556_v8  ;;  %1456 = vmatmul.mubr.bf16.vlgmr.msra.gmra.mxu1 %v1093_v57  ;;  %v902_v3 = vmax.f32 %v900_v19, %v901_v36  ;;  %v3972_v8 = vld [vmem:[%s5117_s4 + $0x128] sm:$0xff]   ;;  %v3974_v58 = vld [vmem:[%s5117_s4 + $0x118] sm:$0xff]  }
 0x139   :  { %v985_v63 = vrot.slane %v984_v46, 1  ;;  %v992_v44 = vrot.slane %v991_v1, 1  ;;  %v701_v51 = vrot.slane %v687_v56, %v4481_v32  ;;  %v702_v43 = vcombine.high %v694_v24, %v694_v24  ;;  %3812 = vmatpush3.bf16.msra.mxu1 %v4463_v42  ;;  %v3976_v54 = vld [vmem:[%s5117_s4 + $0x108] sm:$0xff]  }
 0x13a   :  { %v1059_v45 = vsel %vm1034_vm6, %v972_v55, %v1058_v31  ;;  %v910_v2 = vsel %vm99_vm1, %v694_v24, -inf  ;;  %v979_v52 = vmax.f32 %v977_v49, %v978_v62  ;;  %1505 = vmatmul.mubr.bf16.vlgmr.msra.gmra.mxu0 %v1095_v0  ;;  %3813 = vmatprep.subr.bf16.mxu1 %v3971_v61  ;;  %v1049_v16 = vsel %vm1028_vm3, %v895_v37, %v888_v35  ;;  %v3977_v55 = vld [vmem:[%s5117_s4 + $0x100] sm:$0xff]  }
 0x13b   :  { %v986_v5 = vmax.f32 %v984_v46, %v985_v63  ;;  %v993_v7 = vmax.f32 %v991_v1, %v992_v44  ;;  %v911_v50 = vrot.slane %v910_v2, 4  ;;  %v703_v9 = vcombine.high %v701_v51, %v701_v51 }
 0x13c   :  { %v917_v10 = vsel %vm99_vm1, %v702_v43, -inf  ;;  %v924_v28 = vsel %vm99_vm1, %v701_v51, -inf  ;;  %v1060_v11 = vsel %vm1036_vm7, %v979_v52, %v1059_v45  ;;  %v909_v21 = vmax.f32 %v4588_v22, %v908_v40 }
 0x13d   :  { %v912_v12 = vmax.f32 %v910_v2, %v911_v50  ;;  %v918_v13 = vrot.slane %v917_v10, 4  ;;  %v925_v14 = vrot.slane %v924_v28, 4  ;;  %v1061_v42 = vsel %vm1038_vm8, %v986_v5, %v1060_v11  ;;  %3814 = vmatpush3.bf16.msra.mxu1 %v3971_v61  ;;  %v1090_v2 = vld [vmem:[#allocation2 + $0xc] sm:$0xff]  ;;  %v3978_v50 = vld [vmem:[%s5120_s7 + $0x78] sm:$0xff]  }
 0x13e   :  { %v931_v17 = vsel %vm99_vm1, %v703_v9, -inf  ;;  %v4618_v18 = vsel %vm1040_vm9, %v993_v7, %v1061_v42  ;;  %3815 = vmatprep.subr.bf16.mxu1 %v3972_v8  ;;  %v1050_v25 = vsel %vm1030_vm4, %v902_v3, %v1049_v16  ;;  %v1097_v52 = vpack.c.bf16 %v1090_v2, %v4577_v53  ;;  %v3979_v3 = vld [vmem:[%s5120_s7 + $0x38] sm:$0xff]   ;;  %3628 = vmatprep.subr.bf16.mxu0 %v3978_v50  ;;  %v3985_v11 = vld [vmem:[%s5120_s7 + $0xb0] sm:$0xff]   ;;  %v3989_v16 = vld [vmem:[%s5120_s7 + $0xa8] sm:$0xff]  }
 0x13f   :  { %v913_v19 = vrot.slane %v912_v12, 2  ;;  %v919_v20 = vmax.f32 %v917_v10, %v918_v13  ;;  %v926_v6 = vmax.f32 %v924_v28, %v925_v14  ;;  %1070 = vst [vmem:[#allocation2 + $0x22] sm:$0xff] %v4618_v18  ;;  %v932_v23 = vrot.slane %v931_v17, 4  ;;  %v3980_v9 = vld [vmem:[%s5120_s7 + $0xf8] sm:$0xff]   ;;  %3629 = vmatpush3.bf16.msra.mxu0 %v3979_v3  ;;  %v3982_v10 = vld [vmem:[%s5120_s7 + $0x70] sm:$0xff]   ;;  %v3987_v13 = vld [vmem:[%s5120_s7 + $0x28] sm:$0xff]  }
 0x140   :  { %v1051_v22 = vsel %vm1032_vm5, %v909_v21, %v1050_v25  ;;  %v3981_v53 = vld [vmem:[%s5120_s7 + $0xb8] sm:$0xff]   ;;  %v3983_v28 = vld [vmem:[%s5120_s7 + $0x30] sm:$0xff]   ;;  %3630 = vmatprep.subr.bf16.mxu0 %v3982_v10  ;;  %v3988_v14 = vld [vmem:[%s5120_s7 + $0xe8] sm:$0xff]  }
 0x141   :  { %v914_v26 = vmax.f32 %v912_v12, %v913_v19  ;;  %v920_v27 = vrot.slane %v919_v20, 2  ;;  %v927_v29 = vrot.slane %v926_v6, 2  ;;  %v933_v30 = vmax.f32 %v931_v17, %v932_v23  ;;  %3816 = vmatpush3.bf16.msra.mxu1 %v3972_v8  ;;  %v3984_v8 = vld [vmem:[%s5120_s7 + $0xf0] sm:$0xff]   ;;  %v3986_v12 = vld [vmem:[%s5120_s7 + $0x68] sm:$0xff]   ;;  %v3990_v42 = vld [vmem:[%s5120_s7 + $0x60] sm:$0xff]  }
 0x142   :  { %3817 = vmatprep.subr.bf16.mxu1 %v3973_v59  ;;  %v3991_v17 = vld [vmem:[%s5120_s7 + $0x20] sm:$0xff]   ;;  %v3996_v21 = vld [vmem:[%s5120_s7 + $0xd8] sm:$0xff]   ;;  %v3999_v25 = vld [vmem:[%s5120_s7 + $0x10] sm:$0xff]  }
 0x143   :  { %v915_v31 = vrot.slane %v914_v26, 1  ;;  %v921_v34 = vmax.f32 %v919_v20, %v920_v27  ;;  %v928_v35 = vmax.f32 %v926_v6, %v927_v29  ;;  %v934_v36 = vrot.slane %v933_v30, 2  ;;  %3631 = vmatpush3.bf16.msra.mxu0 %v3983_v28  ;;  %v3993_v19 = vld [vmem:[%s5120_s7 + $0xa0] sm:$0xff]   ;;  %v3994_v20 = vld [vmem:[%s5120_s7 + $0x58] sm:$0xff]   ;;  %v4001_v27 = vld [vmem:[%s5120_s7 + $0x90] sm:$0xff]  }
 0x144   :  { %3632 = vmatprep.subr.bf16.mxu0 %v3986_v12  ;;  %v3995_v6 = vld [vmem:[%s5120_s7 + $0x18] sm:$0xff]   ;;  %v4002_v29 = vld [vmem:[%s5120_s7 + $0x48] sm:$0xff]  }
 0x145   :  { %v916_v60 = vmax.f32 %v914_v26, %v915_v31  ;;  %v922_v37 = vrot.slane %v921_v34, 1  ;;  %v929_v38 = vrot.slane %v928_v35, 1  ;;  %v935_v4 = vmax.f32 %v933_v30, %v934_v36  ;;  %3818 = vmatpush3.bf16.msra.mxu1 %v3973_v59  ;;  %v3997_v23 = vld [vmem:[%s5120_s7 + $0x98] sm:$0xff]   ;;  %v3998_v59 = vld [vmem:[%s5120_s7 + $0x50] sm:$0xff]   ;;  %v4003_v30 = vld [vmem:[%s5120_s7 + $0x8] sm:$0xff]  }
 0x146   :  { %3819 = vmatprep.subr.bf16.mxu1 %v3974_v58  ;;  %v1088_v56 = vld [vmem:[#allocation2 + $0x23] sm:$0xff]  ;;  %v4000_v26 = vld [vmem:[%s5120_s7 + $0xd0] sm:$0xff]  }
 0x147   :  { %v923_v48 = vmax.f32 %v921_v34, %v922_v37  ;;  %v930_v39 = vmax.f32 %v928_v35, %v929_v38  ;;  %v1052_v40 = vsel %vm1034_vm6, %v916_v60, %v1051_v22  ;;  %v936_v41 = vrot.slane %v935_v4, 1  ;;  %v1092_v5 = vld [vmem:[#allocation2 + $0x24] sm:$0xff]  ;;  %3633 = vmatpush3.bf16.msra.mxu0 %v3987_v13 }
 0x148   :  { %3634 = vmatprep.subr.bf16.mxu0 %v3990_v42  ;;  %v4004_v31 = vld [vmem:[%s5120_s7 + $0xc8] sm:$0xff]   ;;  %v4006_v35 = vld [vmem:[%s5120_s7 + $0x40] sm:$0xff]  }
 0x149   :  { %v1053_v47 = vsel %vm1036_vm7, %v923_v48, %v1052_v40  ;;  %v937_v49 = vmax.f32 %v935_v4, %v936_v41  ;;  %3820 = vmatpush3.bf16.msra.mxu1 %v3974_v58  ;;  %v4005_v34 = vld [vmem:[%s5120_s7 + $0x88] sm:$0xff]   ;;  %v4008_v36 = vld [vmem:[%s5120_s7 + $0xc0] sm:$0xff]  }
 0x14a   :  { %v1054_v46 = vsel %vm1038_vm8, %v930_v39, %v1053_v47  ;;  %3821 = vmatprep.subr.bf16.mxu1 %v3975_v15  ;;  %v4007_v22 = vld [vmem:[%s5120_s7] sm:$0xff]  }
 0x14b   :  { %v1055_v1 = vsel %vm1040_vm9, %v937_v49, %v1054_v46  ;;  %3635 = vmatpush3.bf16.msra.mxu0 %v3991_v17  ;;  %v4009_v58 = vld [vmem:[%s5120_s7 + $0x80] sm:$0xff]  }
 0x14c   :  { %1069 = vst [vmem:[#allocation2 + $0x1a] sm:$0xff] %v1055_v1  ;;  %v1100_v43 = vpack.c.bf16 %v4618_v18, %v1055_v1  ;;  %v3992_v18 = vld [vmem:[%s5120_s7 + $0xe0] sm:$0xff]   ;;  %3636 = vmatprep.subr.bf16.mxu0 %v3994_v20 }
 0x14d   :  { %3822 = vmatpush3.bf16.msra.mxu1 %v3975_v15 }
 0x14e   :  { %3823 = vmatprep.subr.bf16.mxu1 %v3976_v54 }
 0x14f   :  { %3637 = vmatpush3.bf16.msra.mxu0 %v3995_v6 }
 0x150   :  { %3638 = vmatprep.subr.bf16.mxu0 %v3998_v59 }
 0x151   :  { %3824 = vmatpush3.bf16.msra.mxu1 %v3976_v54 }
 0x152   :  { %3825 = vmatprep.subr.bf16.mxu1 %v3977_v55 }
 0x153   :  { %v1079_v24 = vld [vmem:[#allocation2 + $0x19] sm:$0xff]  ;;  %v1080_v57 = vld [vmem:[#allocation2 + $0x21] sm:$0xff]  ;;  %3639 = vmatpush3.bf16.msra.mxu0 %v3999_v25 }
 0x154   :  { %v1087_v61 = vld [vmem:[#allocation2 + $0x1b] sm:$0xff]  ;;  %v1099_v62 = vpack.c.bf16 %v1080_v57, %v1079_v24  ;;  %3640 = vmatprep.subr.bf16.mxu0 %v4002_v29 }
 0x155   :  { %v1101_v63 = vpack.c.bf16 %v1088_v56, %v1087_v61  ;;  %v1075_v44 = vld [vmem:[#allocation2 + $0x18] sm:$0xff]  ;;  %v1076_v0 = vld [vmem:[#allocation2 + $0x20] sm:$0xff]  ;;  %3826 = vmatpush3.bf16.msra.mxu1 %v3977_v55 }
 0x156   :  { %v1091_v45 = vld [vmem:[#allocation2 + $0x1c] sm:$0xff]  ;;  %v1098_v51 = vpack.c.bf16 %v1076_v0, %v1075_v44  ;;  %1463 = vmatprep.mubr.bf16.mxu1 %v1099_v62  ;;  %3650 = vmatprep.subr.bf16.mxu1 %v3980_v9 }
 0x157   :  { %1831 = vst [vmem:[#allocation2 + $0x22] sm:$0x3] %v4110_v33  ;;  %1512 = vmatprep.mubr.bf16.mxu0 %v1101_v63  ;;  %v1102_v7 = vpack.c.bf16 %v1092_v5, %v1091_v45  ;;  %3641 = vmatpush3.bf16.msra.mxu0 %v4003_v30 }
 0x158   :  { %1464 = vmatmul.mubr.bf16.gmra.mxu1 %v1098_v51  ;;  %1513 = vmatmul.mubr.bf16.gmra.mxu0 %v1100_v43  ;;  %v4746_v51 = vld [vmem:[%s5118_s5] ss:$0 sm:$0xff] }
 0x159   :  { %3827 = vmatprep.mubr.bf16.mxu1 %v1097_v52  ;;  %3642 = vmatprep.subr.bf16.mxu0 %v4006_v35  ;;  %v4751_v52 = vld [vmem:[%s5119_s6] ss:$0 sm:$0xff] }
 0x15b   :  { %3643 = vmatpush3.bf16.msra.mxu0 %v4007_v22 }
 0x15c   :  { %3831 = vmatprep.subr.bf16.mxu0 %v4110_v33 }
 0x160   :  { %3828 = vmatmul.mubr.bf16.vlgmr.msra.gmra.mxu1 %v1102_v7 }
 0x161   :  { %3651 = vmatpush3.bf16.msra.mxu1 %v3981_v53 }
 0x162   :  { %3652 = vmatprep.subr.bf16.mxu1 %v3984_v8 }
 0x165   :  { %3653 = vmatpush3.bf16.msra.mxu1 %v3985_v11 }
 0x166   :  { %3654 = vmatprep.subr.bf16.mxu1 %v3988_v14 }
 0x169   :  { %3655 = vmatpush3.bf16.msra.mxu1 %v3989_v16 }
 0x16a   :  { %3656 = vmatprep.subr.bf16.mxu1 %v3992_v18 }
 0x16d   :  { %3657 = vmatpush3.bf16.msra.mxu1 %v3993_v19 }
 0x16e   :  { %3658 = vmatprep.subr.bf16.mxu1 %v3996_v21 }
 0x171   :  { %3659 = vmatpush3.bf16.msra.mxu1 %v3997_v23 }
 0x172   :  { %3660 = vmatprep.subr.bf16.mxu1 %v4000_v26 }
 0x175   :  { %3661 = vmatpush3.bf16.msra.mxu1 %v4001_v27 }
 0x176   :  { %3662 = vmatprep.subr.bf16.mxu1 %v4004_v31 }
 0x179   :  { %3663 = vmatpush3.bf16.msra.mxu1 %v4005_v34 }
 0x17a   :  { %3664 = vmatprep.subr.bf16.mxu1 %v4008_v36 }
 0x17d   :  { %3665 = vmatpush3.bf16.msra.mxu1 %v4009_v58 }
 0x1f8   :  { %v3578_v60 = vpop.f32.mrf.mxu1 }
 0x1fa   :  { %v3606_v37 = vpop.f32.mrf.mxu0  ;;  %v3579_v38 = vpop.f32.mrf.mxu1 }
 0x1fb   :  { %v3580_v24 = vadd.f32 %v3579_v38, %v3578_v60 }
 0x1fc   :  { %v3607_v4 = vpop.f32.mrf.mxu0  ;;  %v3581_v48 = vpop.f32.mrf.mxu1 }
 0x1fd   :  { %v3608_v57 = vadd.f32 %v3607_v4, %v3606_v37 }
 0x1fe   :  { %v3609_v39 = vpop.f32.mrf.mxu0  ;;  %v3582_v40 = vpop.f32.mrf.mxu1 }
 0x1ff   :  { %v1507_v2 = vadd.f32 %v3608_v57, %v3580_v24  ;;  %v3583_v8 = vadd.f32 %v3582_v40, %v3581_v48 }
 0x200   :  { %v3610_v41 = vpop.f32.mrf.mxu0 }
 0x201   :  { %v3611_v11 = vadd.f32 %v3610_v41, %v3609_v39 }
 0x203   :  { %v1510_v20 = vadd.f32 %v3611_v11, %v3583_v8 }
 0x218   :  { %v3584_v15 = vpop.f32.mrf.mxu1  ;;  %v3612_v47 = vpop.f32.mrf.mxu0 }
 0x21a   :  { %v3585_v49 = vpop.f32.mrf.mxu1  ;;  %v3613_v46 = vpop.f32.mrf.mxu0 }
 0x21b   :  { %v3586_v1 = vadd.f32 %v3585_v49, %v3584_v15  ;;  %v3614_v54 = vadd.f32 %v3613_v46, %v3612_v47 }
 0x21c   :  { %v3587_v55 = vpop.f32.mrf.mxu1  ;;  %v3615_v56 = vpop.f32.mrf.mxu0 }
 0x21d   :  { %v1515_v0 = vadd.f32 %v3614_v54, %v3586_v1 }
 0x21e   :  { %v3588_v61 = vpop.f32.mrf.mxu1  ;;  %v3616_v62 = vpop.f32.mrf.mxu0 }
 0x21f   :  { %v3589_v63 = vadd.f32 %v3588_v61, %v3587_v55  ;;  %v3617_v44 = vadd.f32 %v3616_v62, %v3615_v56 }
 0x220   :  { %v3829_v45 = vpop.f32.mrf.mxu1 }
 0x221   :  { %v1564_v43 = vadd.f32 %v3829_v45, %v1515_v0  ;;  %v1518_v3 = vadd.f32 %v3617_v44, %v3589_v63 }
 0x222   :  { %v1555_v5 = vpop.f32.mrf.mxu1 }
 0x223   :  { %v1579_v7 = vmul.f32 %v4746_v51, %v1564_v43  ;;  %v1556_v50 = vadd.f32 %v1555_v5, %v1507_v2 }
 0x224   :  { %v3830_v9 = vpop.f32.mrf.mxu1 }
 0x225   :  { %v1590_v53 = vadd.f32 %v4751_v52, %v1579_v7  ;;  %v1577_v10 = vmul.f32 %v4746_v51, %v1556_v50  ;;  %v1567_v28 = vadd.f32 %v3830_v9, %v1518_v3 }
 0x226   :  { %v1558_v19 = vpop.f32.mrf.mxu1 }
 0x227   :  { %v1594_v12 = vmax.f32 %v1590_v53, 0.0  ;;  %v1588_v13 = vadd.f32 %v4751_v52, %v1577_v10  ;;  %v1580_v14 = vmul.f32 %v4746_v51, %v1567_v28  ;;  %v1559_v29 = vadd.f32 %v1558_v19, %v1510_v20 }
 0x229   :  { %v1634_v16 = vcombine.high %v1594_v12, %v1594_v12  ;;  %v1641_v42 = vrot.slane %v1594_v12, %v4481_v32  ;;  %v1592_v17 = vmax.f32 %v1588_v13, 0.0  ;;  %v1591_v18 = vadd.f32 %v4751_v52, %v1580_v14 }
 0x22a   :  { %v1578_v8 = vmul.f32 %v4746_v51, %v1559_v29 }
 0x22b   :  { %v1648_v6 = vrot.slane %v1634_v16, %v4481_v32  ;;  %v1649_v21 = vcombine.high %v1641_v42, %v1641_v42  ;;  %v1740_v23 = vsel %vm99_vm1, %v1641_v42, -inf  ;;  %v1600_v59 = vcombine.high %v1592_v17, %v1592_v17 }
 0x22c   :  { %v1741_v25 = vrot.slane %v1740_v23, 4  ;;  %v1607_v26 = vrot.slane %v1592_v17, %v4481_v32  ;;  %v1595_v27 = vmax.f32 %v1591_v18, 0.0 }
 0x22d   :  { %v1650_v30 = vcombine.high %v1648_v6, %v1648_v6  ;;  %v1747_v31 = vsel %vm99_vm1, %v1649_v21, -inf  ;;  %v1754_v34 = vsel %vm99_vm1, %v1648_v6, -inf  ;;  %v1614_v35 = vrot.slane %v1600_v59, %v4481_v32 }
 0x22e   :  { %v1742_v36 = vmax.f32 %v1740_v23, %v1741_v25  ;;  %v1748_v22 = vrot.slane %v1747_v31, 4  ;;  %v1755_v58 = vrot.slane %v1754_v34, 4  ;;  %v1615_v60 = vcombine.high %v1607_v26, %v1607_v26 }
 0x22f   :  { %v1761_v37 = vsel %vm99_vm1, %v1650_v30, -inf  ;;  %v1616_v38 = vcombine.high %v1614_v35, %v1614_v35  ;;  %v1684_v4 = vsel %vm99_vm1, %v1607_v26, -inf  ;;  %v1698_v48 = vsel %vm99_vm1, %v1614_v35, -inf }
 0x230   :  { %v1743_v39 = vrot.slane %v1742_v36, 2  ;;  %v1749_v40 = vmax.f32 %v1747_v31, %v1748_v22  ;;  %v1756_v41 = vmax.f32 %v1754_v34, %v1755_v58  ;;  %v1762_v15 = vrot.slane %v1761_v37, 4 }
 0x231   :  { %v1685_v47 = vrot.slane %v1684_v4, 4  ;;  %v1691_v49 = vsel %vm99_vm1, %v1615_v60, -inf  ;;  %v1699_v46 = vrot.slane %v1698_v48, 4  ;;  %v1705_v1 = vsel %vm99_vm1, %v1616_v38, -inf }
 0x232   :  { %v1744_v54 = vmax.f32 %v1742_v36, %v1743_v39  ;;  %v1750_v55 = vrot.slane %v1749_v40, 2  ;;  %v1757_v56 = vrot.slane %v1756_v41, 2  ;;  %v1763_v24 = vmax.f32 %v1761_v37, %v1762_v15 }
 0x233   :  { %v1686_v57 = vmax.f32 %v1684_v4, %v1685_v47  ;;  %v1692_v61 = vrot.slane %v1691_v49, 4  ;;  %v1700_v62 = vmax.f32 %v1698_v48, %v1699_v46  ;;  %v1706_v63 = vrot.slane %v1705_v1, 4 }
 0x234   :  { %v1745_v44 = vrot.slane %v1744_v54, 1  ;;  %v1751_v0 = vmax.f32 %v1749_v40, %v1750_v55  ;;  %v1758_v45 = vmax.f32 %v1756_v41, %v1757_v56  ;;  %v1764_v43 = vrot.slane %v1763_v24, 2 }
 0x235   :  { %v1687_v2 = vrot.slane %v1686_v57, 2  ;;  %v1693_v5 = vmax.f32 %v1691_v49, %v1692_v61  ;;  %v1701_v7 = vrot.slane %v1700_v62, 2  ;;  %v1707_v50 = vmax.f32 %v1705_v1, %v1706_v63 }
 0x236   :  { %v1752_v3 = vrot.slane %v1751_v0, 1  ;;  %v1759_v9 = vrot.slane %v1758_v45, 1  ;;  %v1765_v53 = vmax.f32 %v1763_v24, %v1764_v43  ;;  %v1651_v13 = vcombine.high %v1595_v27, %v1595_v27 }
 0x237   :  { %v1688_v10 = vmax.f32 %v1686_v57, %v1687_v2  ;;  %v1694_v28 = vrot.slane %v1693_v5, 2  ;;  %v1702_v12 = vmax.f32 %v1700_v62, %v1701_v7  ;;  %v1746_v14 = vmax.f32 %v1744_v54, %v1745_v44 }
 0x238   :  { %v1753_v11 = vmax.f32 %v1751_v0, %v1752_v3  ;;  %v1766_v16 = vrot.slane %v1765_v53, 1  ;;  %v1708_v17 = vrot.slane %v1707_v50, 2  ;;  %v1760_v18 = vmax.f32 %v1758_v45, %v1759_v9 }
 0x239   :  { %v1695_v42 = vmax.f32 %v1693_v5, %v1694_v28  ;;  %v1658_v19 = vrot.slane %v1595_v27, %v4481_v32  ;;  %v1665_v20 = vrot.slane %v1651_v13, %v4481_v32  ;;  %v1689_v21 = vrot.slane %v1688_v10, 1 }
 0x23a   :  { %v1819_v6 = vsel %vm1028_vm3, %v1753_v11, %v1746_v14  ;;  %v1589_v59 = vadd.f32 %v4751_v52, %v1578_v8  ;;  %v1703_v25 = vrot.slane %v1702_v12, 1  ;;  %v1767_v30 = vmax.f32 %v1765_v53, %v1766_v16 }
 0x23b   :  { %v1696_v23 = vrot.slane %v1695_v42, 1  ;;  %v1666_v51 = vcombine.high %v1658_v19, %v1658_v19  ;;  %v1667_v26 = vcombine.high %v1665_v20, %v1665_v20  ;;  %v1768_v29 = vsel %vm99_vm1, %v1658_v19, -inf }
 0x23c   :  { %v1709_v31 = vmax.f32 %v1707_v50, %v1708_v17  ;;  %v1769_v34 = vrot.slane %v1768_v29, 4  ;;  %v1782_v35 = vsel %vm99_vm1, %v1665_v20, -inf  ;;  %v1820_v27 = vsel %vm1030_vm4, %v1760_v18, %v1819_v6 }
 0x23d   :  { %v1775_v36 = vsel %vm99_vm1, %v1666_v51, -inf  ;;  %v1783_v22 = vrot.slane %v1782_v35, 4  ;;  %v1789_v58 = vsel %vm99_vm1, %v1667_v26, -inf  ;;  %v1697_v60 = vmax.f32 %v1695_v42, %v1696_v23 }
 0x23e   :  { %v1770_v37 = vmax.f32 %v1768_v29, %v1769_v34  ;;  %v1776_v52 = vrot.slane %v1775_v36, 4  ;;  %v1790_v38 = vrot.slane %v1789_v58, 4  ;;  %v1690_v4 = vmax.f32 %v1688_v10, %v1689_v21 }
 0x23f   :  { %v1704_v48 = vmax.f32 %v1702_v12, %v1703_v25  ;;  %v1784_v39 = vmax.f32 %v1782_v35, %v1783_v22  ;;  %v1593_v40 = vmax.f32 %v1589_v59, 0.0  ;;  %v1710_v41 = vrot.slane %v1709_v31, 1 }
 0x240   :  { %v1771_v15 = vrot.slane %v1770_v37, 2  ;;  %v1777_v47 = vmax.f32 %v1775_v36, %v1776_v52  ;;  %v1791_v49 = vmax.f32 %v1789_v58, %v1790_v38  ;;  %v1821_v1 = vsel %vm1032_vm5, %v1767_v30, %v1820_v27 }
 0x241   :  { %v1785_v46 = vrot.slane %v1784_v39, 2  ;;  %v1617_v54 = vcombine.high %v1593_v40, %v1593_v40  ;;  %v1624_v55 = vrot.slane %v1593_v40, %v4481_v32  ;;  %v1812_v56 = vsel %vm1028_vm3, %v1697_v60, %v1690_v4 }
 0x242   :  { %v1772_v24 = vmax.f32 %v1770_v37, %v1771_v15  ;;  %v1778_v57 = vrot.slane %v1777_v47, 2  ;;  %v1792_v61 = vrot.slane %v1791_v49, 2  ;;  %v1711_v19 = vmax.f32 %v1709_v31, %v1710_v41 }
 0x243   :  { %v1786_v62 = vmax.f32 %v1784_v39, %v1785_v46  ;;  %v1631_v63 = vrot.slane %v1617_v54, %v4481_v32  ;;  %v1632_v44 = vcombine.high %v1624_v55, %v1624_v55  ;;  %v1712_v0 = vsel %vm99_vm1, %v1624_v55, -inf }
 0x244   :  { %v1773_v45 = vrot.slane %v1772_v24, 1  ;;  %v1779_v43 = vmax.f32 %v1777_v47, %v1778_v57  ;;  %v1793_v2 = vmax.f32 %v1791_v49, %v1792_v61  ;;  %v1713_v5 = vrot.slane %v1712_v0, 4 }
 0x245   :  { %v1787_v7 = vrot.slane %v1786_v62, 1  ;;  %v1633_v50 = vcombine.high %v1631_v63, %v1631_v63  ;;  %v1719_v3 = vsel %vm99_vm1, %v1632_v44, -inf  ;;  %v1726_v9 = vsel %vm99_vm1, %v1631_v63, -inf  ;;  %v4010_v63 = vld [vmem:[%s5120_s7 + $0x138] sm:$0xff]  }
 0x246   :  { %v1774_v53 = vmax.f32 %v1772_v24, %v1773_v45  ;;  %v1780_v10 = vrot.slane %v1779_v43, 1  ;;  %v1794_v28 = vrot.slane %v1793_v2, 1  ;;  %v1714_v8 = vmax.f32 %v1712_v0, %v1713_v5  ;;  %v4011_v45 = vld [vmem:[%s5120_s7 + $0x130] sm:$0xff]   ;;  %v4014_v5 = vld [vmem:[%s5120_s7 + $0x118] sm:$0xff]  }
 0x247   :  { %v1788_v11 = vmax.f32 %v1786_v62, %v1787_v7  ;;  %v1720_v12 = vrot.slane %v1719_v3, 4  ;;  %v1727_v13 = vrot.slane %v1726_v9, 4  ;;  %v1733_v14 = vsel %vm99_vm1, %v1633_v50, -inf  ;;  %v4015_v7 = vld [vmem:[%s5120_s7 + $0x110] sm:$0xff]   ;;  %v4016_v50 = vld [vmem:[%s5120_s7 + $0x108] sm:$0xff]  }
 0x248   :  { %v1781_v16 = vmax.f32 %v1779_v43, %v1780_v10  ;;  %v1795_v42 = vmax.f32 %v1793_v2, %v1794_v28  ;;  %v1822_v17 = vsel %vm1034_vm6, %v1774_v53, %v1821_v1  ;;  %v1715_v18 = vrot.slane %v1714_v8, 2  ;;  %v4012_v43 = vld [vmem:[%s5120_s7 + $0x128] sm:$0xff]   ;;  %v4013_v2 = vld [vmem:[%s5120_s7 + $0x120] sm:$0xff]   ;;  %v4018_v53 = vld [vmem:[%s5123_s10 + $0x78] sm:$0xff]  }
 0x249   :  { %v1721_v20 = vmax.f32 %v1719_v3, %v1720_v12  ;;  %v1728_v6 = vmax.f32 %v1726_v9, %v1727_v13  ;;  %v1734_v21 = vrot.slane %v1733_v14, 4  ;;  %v1813_v23 = vsel %vm1030_vm4, %v1704_v48, %v1812_v56  ;;  %v4017_v3 = vld [vmem:[%s5120_s7 + $0x100] sm:$0xff]   ;;  %v4019_v10 = vld [vmem:[%s5123_s10 + $0x38] sm:$0xff]   ;;  %3681 = vmatprep.subr.bf16.mxu1 %v4018_v53  ;;  %v4023_v12 = vld [vmem:[%s5123_s10 + $0x30] sm:$0xff]  }
 0x24a   :  { %v1823_v59 = vsel %vm1036_vm7, %v1781_v16, %v1822_v17  ;;  %v1716_v25 = vmax.f32 %v1714_v8, %v1715_v18  ;;  %v1814_v22 = vsel %vm1032_vm5, %v1711_v19, %v1813_v23  ;;  %v4020_v28 = vld [vmem:[%s5123_s10 + $0xf8] sm:$0xff]   ;;  %v4024_v13 = vld [vmem:[%s5123_s10 + $0xf0] sm:$0xff]   ;;  %v4026_v16 = vld [vmem:[%s5123_s10 + $0x68] sm:$0xff]  }
 0x24b   :  { %v1824_v51 = vsel %vm1038_vm8, %v1788_v11, %v1823_v59  ;;  %v1722_v26 = vrot.slane %v1721_v20, 2  ;;  %v1729_v29 = vrot.slane %v1728_v6, 2  ;;  %v1735_v30 = vmax.f32 %v1733_v14, %v1734_v21  ;;  %v4021_v8 = vld [vmem:[%s5123_s10 + $0xb8] sm:$0xff]   ;;  %v4022_v11 = vld [vmem:[%s5123_s10 + $0x70] sm:$0xff]   ;;  %v4028_v17 = vld [vmem:[%s5123_s10 + $0xe8] sm:$0xff]  }
 0x24c   :  { %v1825_v34 = vsel %vm1040_vm9, %v1795_v42, %v1824_v51  ;;  %v1717_v35 = vrot.slane %v1716_v25, 1  ;;  %v4025_v14 = vld [vmem:[%s5123_s10 + $0xb0] sm:$0xff]   ;;  %v4027_v42 = vld [vmem:[%s5123_s10 + $0x28] sm:$0xff]   ;;  %v4030_v19 = vld [vmem:[%s5123_s10 + $0x60] sm:$0xff]  }
 0x24d   :  { %1829 = vst [vmem:[#allocation2 + $0x1a] sm:$0xff] %v1825_v34  ;;  %v1723_v27 = vmax.f32 %v1721_v20, %v1722_v26  ;;  %v1730_v36 = vmax.f32 %v1728_v6, %v1729_v29  ;;  %v1736_v31 = vrot.slane %v1735_v30, 2  ;;  %v4029_v18 = vld [vmem:[%s5123_s10 + $0xa8] sm:$0xff]   ;;  %v4031_v20 = vld [vmem:[%s5123_s10 + $0x20] sm:$0xff]   ;;  %v4034_v23 = vld [vmem:[%s5123_s10 + $0x58] sm:$0xff]  }
 0x24e   :  { %v1718_v58 = vmax.f32 %v1716_v25, %v1717_v35  ;;  %v4032_v6 = vld [vmem:[%s5123_s10 + $0xe0] sm:$0xff]   ;;  %v4035_v59 = vld [vmem:[%s5123_s10 + $0x18] sm:$0xff]   ;;  %v4038_v26 = vld [vmem:[%s5123_s10 + $0x50] sm:$0xff]  }
 0x24f   :  { %v1724_v60 = vrot.slane %v1723_v27, 1  ;;  %v1731_v37 = vrot.slane %v1730_v36, 1  ;;  %v1737_v52 = vmax.f32 %v1735_v30, %v1736_v31  ;;  %v4033_v21 = vld [vmem:[%s5123_s10 + $0xa0] sm:$0xff]   ;;  %v4036_v25 = vld [vmem:[%s5123_s10 + $0xd8] sm:$0xff]   ;;  %v4039_v29 = vld [vmem:[%s5123_s10 + $0x10] sm:$0xff]  }
 0x250   :  { %v1815_v38 = vsel %vm1034_vm6, %v1718_v58, %v1814_v22  ;;  %v4037_v51 = vld [vmem:[%s5123_s10 + $0x98] sm:$0xff]   ;;  %v4040_v30 = vld [vmem:[%s5123_s10 + $0xd0] sm:$0xff]   ;;  %v4042_v35 = vld [vmem:[%s5123_s10 + $0x48] sm:$0xff]  }
 0x251   :  { %v1725_v4 = vmax.f32 %v1723_v27, %v1724_v60  ;;  %v1732_v48 = vmax.f32 %v1730_v36, %v1731_v37  ;;  %v1738_v39 = vrot.slane %v1737_v52, 1  ;;  %v4043_v27 = vld [vmem:[%s5123_s10 + $0x8] sm:$0xff]   ;;  %v4046_v22 = vld [vmem:[%s5123_s10 + $0x40] sm:$0xff]  }
 0x252   :  { %v4044_v36 = vld [vmem:[%s5123_s10 + $0xc8] sm:$0xff]   ;;  %v4048_v58 = vld [vmem:[%s5123_s10 + $0xc0] sm:$0xff]  }
 0x253   :  { %v1739_v40 = vmax.f32 %v1737_v52, %v1738_v39  ;;  %v1816_v41 = vsel %vm1036_vm7, %v1725_v4, %v1815_v38  ;;  %v4045_v31 = vld [vmem:[%s5123_s10 + $0x88] sm:$0xff]   ;;  %v4047_v60 = vld [vmem:[%s5123_s10] sm:$0xff]  }
 0x254   :  { %v1817_v15 = vsel %vm1038_vm8, %v1732_v48, %v1816_v41  ;;  %v1835_v47 = vld [vmem:[#allocation2 + $0x19] sm:$0xff] }
 0x255   :  { %v1818_v49 = vsel %vm1040_vm9, %v1739_v40, %v1817_v15  ;;  %v1839_v46 = vld [vmem:[#allocation2 + $0x1b] sm:$0xff] }
 0x256   :  { %v1833_v1 = vld [vmem:[#allocation2 + $0x18] sm:$0xff]  ;;  %1828 = vst [vmem:[#allocation2 + $0x2] sm:$0xff] %v1818_v49  ;;  %v1844_v0 = vpack.c.bf16 %v1825_v34, %v1818_v49  ;;  %v4041_v34 = vld [vmem:[%s5123_s10 + $0x90] sm:$0xff]   ;;  %v4049_v37 = vld [vmem:[%s5123_s10 + $0x80] sm:$0xff]  }
 0x257   :  { %v1841_v54 = vld [vmem:[#allocation2 + $0x1c] sm:$0xff] }
 0x258   :  { %2429 = vst [vmem:[#allocation2 + $0x1e] sm:$0x3] %v4110_v33 }
 0x25d   :  { %v1834_v55 = vld [vmem:[#allocation2 + $0x1] sm:$0xff] }
 0x25e   :  { %v1838_v56 = vld [vmem:[#allocation2 + $0x3] sm:$0xff]  ;;  %v1843_v57 = vpack.c.bf16 %v1835_v47, %v1834_v55 }
 0x25f   :  { %v1832_v24 = vld [vmem:[#allocation2] sm:$0xff]  ;;  %v1845_v61 = vpack.c.bf16 %v1839_v46, %v1838_v56 }
 0x260   :  { %v1842_v62 = vpack.c.bf16 %v1833_v1, %v1832_v24  ;;  %v1840_v44 = vld [vmem:[#allocation2 + $0x4] sm:$0xff]  ;;  %2199 = vmatprep.mubr.bf16.mxu0 %v1843_v57  ;;  %v3447_v56 = vld [vmem:[%s5121_s8] ss:$0 sm:$0xff] }
 0x261   :  { %2428 = vst [vmem:[#allocation2 + $0x6] sm:$0x3] %v4110_v33  ;;  %2240 = vmatprep.mubr.bf16.mxu1 %v1845_v61  ;;  %v1846_v9 = vpack.c.bf16 %v1841_v54, %v1840_v44  ;;  %v3448_v57 = vld [vmem:[%s5122_s9] ss:$0 sm:$0xff] }
 0x262   :  { %2200 = vmatmul.mubr.bf16.vlgmr.msra.gmra.mxu0 %v1842_v62  ;;  %2241 = vmatmul.mubr.bf16.vlgmr.msra.gmra.mxu1 %v1844_v0 }
 0x263   :  { %3832 = vmatpush3.bf16.msra.mxu0 %v4010_v63  ;;  %3847 = vmatprep.mubr.msk.bf16.mxu0 %vm4112_vm10, %v4110_v33 }
 0x264   :  { %3833 = vmatprep.subr.bf16.mxu0 %v4110_v33  ;;  %3682 = vmatpush3.bf16.msra.mxu1 %v4019_v10 }
 0x265   :  { %3683 = vmatprep.subr.bf16.mxu1 %v4022_v11 }
 0x267   :  { %3834 = vmatpush3.bf16.msra.mxu0 %v4011_v45 }
 0x268   :  { %3835 = vmatprep.subr.bf16.mxu0 %v4110_v33  ;;  %3684 = vmatpush3.bf16.msra.mxu1 %v4023_v12 }
 0x269   :  { %3685 = vmatprep.subr.bf16.mxu1 %v4026_v16 }
 0x26b   :  { %3836 = vmatpush3.bf16.msra.mxu0 %v4012_v43 }
 0x26c   :  { %3837 = vmatprep.subr.bf16.mxu0 %v4110_v33  ;;  %3686 = vmatpush3.bf16.msra.mxu1 %v4027_v42 }
 0x26d   :  { %3687 = vmatprep.subr.bf16.mxu1 %v4030_v19 }
 0x26f   :  { %3838 = vmatpush3.bf16.msra.mxu0 %v4013_v2 }
 0x270   :  { %3839 = vmatprep.subr.bf16.mxu0 %v4110_v33  ;;  %3688 = vmatpush3.bf16.msra.mxu1 %v4031_v20 }
 0x271   :  { %3689 = vmatprep.subr.bf16.mxu1 %v4034_v23 }
 0x273   :  { %3840 = vmatpush3.bf16.msra.mxu0 %v4014_v5 }
 0x274   :  { %3841 = vmatprep.subr.bf16.mxu0 %v4110_v33  ;;  %3690 = vmatpush3.bf16.msra.mxu1 %v4035_v59 }
 0x275   :  { %3691 = vmatprep.subr.bf16.mxu1 %v4038_v26 }
 0x277   :  { %3842 = vmatpush3.bf16.msra.mxu0 %v4015_v7 }
 0x278   :  { %3843 = vmatprep.subr.bf16.mxu0 %v4110_v33  ;;  %3692 = vmatpush3.bf16.msra.mxu1 %v4039_v29 }
 0x279   :  { %3693 = vmatprep.subr.bf16.mxu1 %v4042_v35 }
 0x27b   :  { %3844 = vmatpush3.bf16.msra.mxu0 %v4016_v50 }
 0x27c   :  { %3845 = vmatprep.subr.bf16.mxu0 %v4110_v33  ;;  %3694 = vmatpush3.bf16.msra.mxu1 %v4043_v27 }
 0x27d   :  { %3695 = vmatprep.subr.bf16.mxu1 %v4046_v22 }
 0x27f   :  { %3846 = vmatpush3.bf16.msra.mxu0 %v4017_v3 }
 0x280   :  { %3703 = vmatprep.subr.bf16.mxu0 %v4020_v28  ;;  %3696 = vmatpush3.bf16.msra.mxu1 %v4047_v60 }
 0x281   :  { %3851 = vmatprep.subr.bf16.mxu1 %v4110_v33 }
 0x282   :  { %3848 = vmatmul.mubr.bf16.vlgmr.msra.gmra.mxu0 %v1846_v9 }
 0x283   :  { %3704 = vmatpush3.bf16.msra.mxu0 %v4021_v8 }
 0x284   :  { %3705 = vmatprep.subr.bf16.mxu0 %v4024_v13 }
 0x287   :  { %3706 = vmatpush3.bf16.msra.mxu0 %v4025_v14 }
 0x288   :  { %3707 = vmatprep.subr.bf16.mxu0 %v4028_v17 }
 0x28b   :  { %3708 = vmatpush3.bf16.msra.mxu0 %v4029_v18 }
 0x28c   :  { %3709 = vmatprep.subr.bf16.mxu0 %v4032_v6 }
 0x28f   :  { %3710 = vmatpush3.bf16.msra.mxu0 %v4033_v21 }
 0x290   :  { %3711 = vmatprep.subr.bf16.mxu0 %v4036_v25 }
 0x293   :  { %3712 = vmatpush3.bf16.msra.mxu0 %v4037_v51 }
 0x294   :  { %3713 = vmatprep.subr.bf16.mxu0 %v4040_v30 }
 0x297   :  { %3714 = vmatpush3.bf16.msra.mxu0 %v4041_v34 }
 0x298   :  { %3715 = vmatprep.subr.bf16.mxu0 %v4044_v36 }
 0x29b   :  { %3716 = vmatpush3.bf16.msra.mxu0 %v4045_v31 }
 0x29c   :  { %3717 = vmatprep.subr.bf16.mxu0 %v4048_v58 }
 0x29f   :  { %3718 = vmatpush3.bf16.msra.mxu0 %v4049_v37 }
 0x2a0   :  { %3871 = vmatprep.subr.bf16.mxu0 %v4110_v33 }
 0x322   :  { %v3644_v52 = vpop.f32.mrf.mxu0  ;;  %v3666_v38 = vpop.f32.mrf.mxu1 }
 0x324   :  { %v3645_v4 = vpop.f32.mrf.mxu0  ;;  %v3667_v48 = vpop.f32.mrf.mxu1 }
 0x325   :  { %v3646_v41 = vadd.f32 %v3645_v4, %v3644_v52  ;;  %v3668_v15 = vadd.f32 %v3667_v48, %v3666_v38 }
 0x326   :  { %v3647_v39 = vpop.f32.mrf.mxu0  ;;  %v3669_v40 = vpop.f32.mrf.mxu1 }
 0x327   :  { %v2243_v54 = vadd.f32 %v3668_v15, %v3646_v41 }
 0x328   :  { %v3648_v47 = vpop.f32.mrf.mxu0  ;;  %v3670_v49 = vpop.f32.mrf.mxu1 }
 0x329   :  { %v3649_v46 = vadd.f32 %v3648_v47, %v3647_v39  ;;  %v3671_v1 = vadd.f32 %v3670_v49, %v3669_v40 }
 0x32b   :  { %v2246_v63 = vadd.f32 %v3671_v1, %v3649_v46 }
 0x342   :  { %v2283_v55 = vpop.f32.mrf.mxu0 }
 0x343   :  { %v2284_v24 = vadd.f32 %v2283_v55, %v2243_v54 }
 0x344   :  { %v3849_v61 = vpop.f32.mrf.mxu0 }
 0x345   :  { %v2297_v62 = vmul.f32 %v3447_v56, %v2284_v24 }
 0x346   :  { %v2286_v44 = vpop.f32.mrf.mxu0 }
 0x347   :  { %v2306_v0 = vadd.f32 %v3448_v57, %v2297_v62  ;;  %v2287_v45 = vadd.f32 %v2286_v44, %v2246_v63 }
 0x348   :  { %v3850_v43 = vpop.f32.mrf.mxu0 }
 0x349   :  { %v2308_v2 = vmax.f32 %v2306_v0, 0.0  ;;  %v2298_v5 = vmul.f32 %v3447_v56, %v2287_v45 }
 0x34b   :  { %v2312_v7 = vcombine.high %v2308_v2, %v2308_v2  ;;  %v2319_v50 = vrot.slane %v2308_v2, %v4481_v32  ;;  %v2307_v3 = vadd.f32 %v3448_v57, %v2298_v5 }
 0x34d   :  { %v2326_v9 = vrot.slane %v2312_v7, %v4481_v32  ;;  %v2327_v53 = vcombine.high %v2319_v50, %v2319_v50  ;;  %v2354_v10 = vsel %vm99_vm1, %v2319_v50, -inf  ;;  %v2309_v28 = vmax.f32 %v2307_v3, 0.0 }
 0x34e   :  { %v2355_v8 = vrot.slane %v2354_v10, 4 }
 0x34f   :  { %v2328_v11 = vcombine.high %v2326_v9, %v2326_v9  ;;  %v2361_v12 = vsel %vm99_vm1, %v2327_v53, -inf  ;;  %v2368_v13 = vsel %vm99_vm1, %v2326_v9, -inf  ;;  %v2329_v14 = vcombine.high %v2309_v28, %v2309_v28 }
 0x350   :  { %v2356_v16 = vmax.f32 %v2354_v10, %v2355_v8  ;;  %v2362_v42 = vrot.slane %v2361_v12, 4  ;;  %v2369_v17 = vrot.slane %v2368_v13, 4  ;;  %v2336_v18 = vrot.slane %v2309_v28, %v4481_v32 }
 0x351   :  { %v2375_v19 = vsel %vm99_vm1, %v2328_v11, -inf  ;;  %v2343_v20 = vrot.slane %v2329_v14, %v4481_v32 }
 0x352   :  { %v2357_v6 = vrot.slane %v2356_v16, 2  ;;  %v2363_v21 = vmax.f32 %v2361_v12, %v2362_v42  ;;  %v2370_v23 = vmax.f32 %v2368_v13, %v2369_v17  ;;  %v2376_v59 = vrot.slane %v2375_v19, 4  ;;  %v4054_v42 = vld [vmem:[%s5123_s10 + $0x138] sm:$0xff]  }
 0x353   :  { %v2344_v25 = vcombine.high %v2336_v18, %v2336_v18  ;;  %v2345_v51 = vcombine.high %v2343_v20, %v2343_v20  ;;  %v2382_v26 = vsel %vm99_vm1, %v2336_v18, -inf  ;;  %v2396_v29 = vsel %vm99_vm1, %v2343_v20, -inf }
 0x354   :  { %v2358_v30 = vmax.f32 %v2356_v16, %v2357_v6  ;;  %v2364_v34 = vrot.slane %v2363_v21, 2  ;;  %v2371_v35 = vrot.slane %v2370_v23, 2  ;;  %v2377_v27 = vmax.f32 %v2375_v19, %v2376_v59  ;;  %v4055_v59 = vld [vmem:[%s5123_s10 + $0x130] sm:$0xff]  }
 0x355   :  { %v2383_v36 = vrot.slane %v2382_v26, 4  ;;  %v2389_v31 = vsel %vm99_vm1, %v2344_v25, -inf  ;;  %v2397_v22 = vrot.slane %v2396_v29, 4  ;;  %v2403_v58 = vsel %vm99_vm1, %v2345_v51, -inf  ;;  %v4056_v25 = vld [vmem:[%s5123_s10 + $0x128] sm:$0xff]   ;;  %v4057_v51 = vld [vmem:[%s5123_s10 + $0x120] sm:$0xff]  }
 0x356   :  { %v2359_v60 = vrot.slane %v2358_v30, 1  ;;  %v2365_v37 = vmax.f32 %v2363_v21, %v2364_v34  ;;  %v2372_v52 = vmax.f32 %v2370_v23, %v2371_v35  ;;  %v2378_v38 = vrot.slane %v2377_v27, 2  ;;  %v4061_v34 = vld [vmem:[%s5123_s10 + $0x100] sm:$0xff]  }
 0x357   :  { %v2384_v4 = vmax.f32 %v2382_v26, %v2383_v36  ;;  %v2390_v48 = vrot.slane %v2389_v31, 4  ;;  %v2398_v39 = vmax.f32 %v2396_v29, %v2397_v22  ;;  %v2404_v40 = vrot.slane %v2403_v58, 4  ;;  %v4058_v26 = vld [vmem:[%s5123_s10 + $0x118] sm:$0xff]   ;;  %v4059_v29 = vld [vmem:[%s5123_s10 + $0x110] sm:$0xff]  }
 0x358   :  { %v2366_v41 = vrot.slane %v2365_v37, 1  ;;  %v2373_v15 = vrot.slane %v2372_v52, 1  ;;  %v2379_v47 = vmax.f32 %v2377_v27, %v2378_v38  ;;  %v2360_v55 = vmax.f32 %v2358_v30, %v2359_v60  ;;  %v4060_v30 = vld [vmem:[%s5123_s10 + $0x108] sm:$0xff]   ;;  %v4063_v36 = vld [vmem:[%s5126_s13 + $0x38] sm:$0xff]   ;;  %v4065_v22 = vld [vmem:[%s5126_s13 + $0x30] sm:$0xff]   ;;  %s4113_s10 = smov [#allocation3]  }
 0x359   :  { %v2385_v49 = vrot.slane %v2384_v4, 2  ;;  %v2391_v46 = vmax.f32 %v2389_v31, %v2390_v48  ;;  %v2399_v1 = vrot.slane %v2398_v39, 2  ;;  %v2405_v54 = vmax.f32 %v2403_v58, %v2404_v40  ;;  %v4064_v31 = vld [vmem:[%s5126_s13 + $0x78] sm:$0xff]   ;;  %v4066_v58 = vld [vmem:[%s5126_s13 + $0x70] sm:$0xff]   ;;  %v4067_v60 = vld [vmem:[%s5126_s13 + $0x28] sm:$0xff]   ;;  %s3331_s20 = sshll.u32 %s4113_s10, 4  ;;  %s3332_s20 = int_to_ptr.vmem [resolvable:$true] %s3331_s20 }
 0x35a   :  { %v2367_v56 = vmax.f32 %v2365_v37, %v2366_v41  ;;  %v2374_v24 = vmax.f32 %v2372_v52, %v2373_v15  ;;  %v2380_v57 = vrot.slane %v2379_v47, 1  ;;  %v4068_v37 = vld [vmem:[%s5126_s13 + $0x68] sm:$0xff]   ;;  %v4069_v52 = vld [vmem:[%s5126_s13 + $0x20] sm:$0xff]   ;;  %v4072_v48 = vld [vmem:[%s5126_s13 + $0x58] sm:$0xff]   ;;  %p4092_p1 = scmp.lt.s32.totalorder %s3332_s20, %s3332_s20 }
 0x35b   :  { %v2386_v61 = vmax.f32 %v2384_v4, %v2385_v49  ;;  %v2392_v62 = vrot.slane %v2391_v46, 2  ;;  %v2400_v63 = vmax.f32 %v2398_v39, %v2399_v1  ;;  %v2406_v44 = vrot.slane %v2405_v54, 2  ;;  %v4070_v38 = vld [vmem:[%s5126_s13 + $0x60] sm:$0xff]   ;;  %v4071_v4 = vld [vmem:[%s5126_s13 + $0x18] sm:$0xff]   ;;  %v4073_v39 = vld [vmem:[%s5126_s13 + $0x10] sm:$0xff]  }
 0x35c   :  { %v2381_v0 = vmax.f32 %v2379_v47, %v2380_v57  ;;  %v2418_v45 = vsel %vm1028_vm3, %v2367_v56, %v2360_v55  ;;  %v4074_v40 = vld [vmem:[%s5126_s13 + $0x50] sm:$0xff]   ;;  %v4075_v41 = vld [vmem:[%s5126_s13 + $0x8] sm:$0xff]   ;;  %v4077_v47 = vld [vmem:[%s5126_s13] sm:$0xff]  }
 0x35d   :  { %v2419_v43 = vsel %vm1030_vm4, %v2374_v24, %v2418_v45  ;;  %v2387_v2 = vrot.slane %v2386_v61, 1  ;;  %v2393_v5 = vmax.f32 %v2391_v46, %v2392_v62  ;;  %v2401_v7 = vrot.slane %v2400_v63, 1  ;;  %v4076_v15 = vld [vmem:[%s5126_s13 + $0x48] sm:$0xff]   ;;  %v4078_v49 = vld [vmem:[%s5126_s13 + $0x40] sm:$0xff]  }
 0x35e   :  { %v2420_v50 = vsel %vm1032_vm5, %v2381_v0, %v2419_v43  ;;  %v2407_v3 = vmax.f32 %v2405_v54, %v2406_v44  ;;  %v3493_v45 = vld [vmem:[%s5124_s11] ss:$0 sm:$0xff] }
 0x35f   :  { %2426 = vst [vmem:[#allocation2 + $0x2] sm:$0xf] %v2420_v50  ;;  %v2394_v9 = vrot.slane %v2393_v5, 1  ;;  %v2402_v53 = vmax.f32 %v2400_v63, %v2401_v7  ;;  %v2388_v28 = vmax.f32 %v2386_v61, %v2387_v2  ;;  %v3494_v2 = vld [vmem:[%s5125_s12] ss:$0 sm:$0xff] }
 0x360   :  { %v2408_v10 = vrot.slane %v2407_v3, 1 }
 0x361   :  { %v2395_v8 = vmax.f32 %v2393_v5, %v2394_v9 }
 0x362   :  { %v2409_v11 = vmax.f32 %v2407_v3, %v2408_v10 }
 0x363   :  { %v2421_v12 = vsel %vm1028_vm3, %v2395_v8, %v2388_v28 }
 0x364   :  { %v2422_v13 = vsel %vm1030_vm4, %v2402_v53, %v2421_v12 }
 0x365   :  { %v2423_v14 = vsel %vm1032_vm5, %v2409_v11, %v2422_v13 }
 0x366   :  { %2427 = vst [vmem:[#allocation2 + $0x1a] sm:$0xf] %v2423_v14 }
 0x36d   :  { %v4050_v16 = vld [vmem:[#allocation2 + $0x1] ss:$24 sps:$4 sm:$0xff]  }
 0x36e   :  { %v4051_v17 = vld [vmem:[#allocation2 + $0x3] ss:$24 sps:$4 sm:$0xff]   ;;  %v2465_v19 = vpack.c.bf16 %v4050_v16, %v4050_v16 }
 0x36f   :  { %v4052_v18 = vld [vmem:[#allocation2] ss:$24 sps:$4 sm:$0xff]   ;;  %v2467_v6 = vpack.c.bf16 %v4051_v17, %v4051_v17  ;;  %v4062_v35 = vld [vmem:[#allocation2 + $0x4] ss:$24 sps:$4 sm:$0xff]  }
 0x370   :  { %v4053_v20 = vld [vmem:[#allocation2 + $0x2] ss:$24 sps:$4 sm:$0xff]   ;;  %v2464_v21 = vpack.c.bf16 %v4052_v18, %v4052_v18  ;;  %2821 = vmatprep.mubr.bf16.mxu1 %v2465_v19  ;;  %v2468_v27 = vpack.c.bf16 %v4062_v35, %v4062_v35 }
 0x371   :  { %v2466_v23 = vpack.c.bf16 %v4053_v20, %v4053_v20  ;;  %2861 = vmatprep.mubr.bf16.mxu0 %v2467_v6 }
 0x372   :  { %2822 = vmatmul.mubr.bf16.vlgmr.msra.gmra.mxu1 %v2464_v21 }
 0x373   :  { %2862 = vmatmul.mubr.bf16.vlgmr.msra.gmra.mxu0 %v2466_v23  ;;  %3852 = vmatpush3.bf16.msra.mxu1 %v4054_v42 }
 0x374   :  { %3853 = vmatprep.subr.bf16.mxu1 %v4110_v33  ;;  %3867 = vmatprep.mubr.msk.bf16.mxu1 %vm4112_vm10, %v4110_v33 }
 0x375   :  { %3887 = vmatprep.mubr.msk.bf16.mxu0 %vm4112_vm10, %v4110_v33  ;;  %3872 = vmatpush3.bf16.msra.mxu0 %v4064_v31 }
 0x376   :  { %3873 = vmatprep.subr.bf16.mxu0 %v4110_v33 }
 0x377   :  { %3854 = vmatpush3.bf16.msra.mxu1 %v4055_v59 }
 0x378   :  { %3855 = vmatprep.subr.bf16.mxu1 %v4110_v33 }
 0x379   :  { %3874 = vmatpush3.bf16.msra.mxu0 %v4066_v58 }
 0x37a   :  { %3875 = vmatprep.subr.bf16.mxu0 %v4110_v33 }
 0x37b   :  { %3856 = vmatpush3.bf16.msra.mxu1 %v4056_v25 }
 0x37c   :  { %3857 = vmatprep.subr.bf16.mxu1 %v4110_v33 }
 0x37d   :  { %3876 = vmatpush3.bf16.msra.mxu0 %v4068_v37 }
 0x37e   :  { %3877 = vmatprep.subr.bf16.mxu0 %v4110_v33 }
 0x37f   :  { %3858 = vmatpush3.bf16.msra.mxu1 %v4057_v51 }
 0x380   :  { %3859 = vmatprep.subr.bf16.mxu1 %v4110_v33 }
 0x381   :  { %3878 = vmatpush3.bf16.msra.mxu0 %v4070_v38 }
 0x382   :  { %3879 = vmatprep.subr.bf16.mxu0 %v4110_v33 }
 0x383   :  { %3860 = vmatpush3.bf16.msra.mxu1 %v4058_v26 }
 0x384   :  { %3861 = vmatprep.subr.bf16.mxu1 %v4110_v33 }
 0x385   :  { %3880 = vmatpush3.bf16.msra.mxu0 %v4072_v48 }
 0x386   :  { %3881 = vmatprep.subr.bf16.mxu0 %v4110_v33 }
 0x387   :  { %3862 = vmatpush3.bf16.msra.mxu1 %v4059_v29 }
 0x388   :  { %3863 = vmatprep.subr.bf16.mxu1 %v4110_v33 }
 0x389   :  { %3882 = vmatpush3.bf16.msra.mxu0 %v4074_v40 }
 0x38a   :  { %3883 = vmatprep.subr.bf16.mxu0 %v4110_v33 }
 0x38b   :  { %3864 = vmatpush3.bf16.msra.mxu1 %v4060_v30 }
 0x38c   :  { %3865 = vmatprep.subr.bf16.mxu1 %v4110_v33 }
 0x38d   :  { %3884 = vmatpush3.bf16.msra.mxu0 %v4076_v15 }
 0x38e   :  { %3885 = vmatprep.subr.bf16.mxu0 %v4110_v33 }
 0x38f   :  { %3866 = vmatpush3.bf16.msra.mxu1 %v4061_v34 }
 0x390   :  { %3891 = vmatprep.subr.bf16.mxu1 %v4110_v33 }
 0x391   :  { %3886 = vmatpush3.bf16.msra.mxu0 %v4078_v49 }
 0x392   :  { %3868 = vmatmul.mubr.bf16.vlgmr.msra.gmra.mxu1 %v2468_v27  ;;  %3911 = vmatprep.subr.bf16.mxu0 %v4110_v33 }
 0x393   :  { %3907 = vmatprep.mubr.msk.bf16.mxu1 %vm4112_vm10, %v4110_v33  ;;  %3892 = vmatpush3.bf16.msra.mxu1 %v4063_v36 }
 0x394   :  { %3893 = vmatprep.subr.bf16.mxu1 %v4110_v33 }
 0x397   :  { %3894 = vmatpush3.bf16.msra.mxu1 %v4065_v22 }
 0x398   :  { %3895 = vmatprep.subr.bf16.mxu1 %v4110_v33 }
 0x39b   :  { %3896 = vmatpush3.bf16.msra.mxu1 %v4067_v60 }
 0x39c   :  { %3897 = vmatprep.subr.bf16.mxu1 %v4110_v33 }
 0x39f   :  { %3898 = vmatpush3.bf16.msra.mxu1 %v4069_v52 }
 0x3a0   :  { %3899 = vmatprep.subr.bf16.mxu1 %v4110_v33 }
 0x3a3   :  { %3900 = vmatpush3.bf16.msra.mxu1 %v4071_v4 }
 0x3a4   :  { %3901 = vmatprep.subr.bf16.mxu1 %v4110_v33 }
 0x3a7   :  { %3902 = vmatpush3.bf16.msra.mxu1 %v4073_v39 }
 0x3a8   :  { %3903 = vmatprep.subr.bf16.mxu1 %v4110_v33 }
 0x3ab   :  { %3904 = vmatpush3.bf16.msra.mxu1 %v4075_v41 }
 0x3ac   :  { %3905 = vmatprep.subr.bf16.mxu1 %v4110_v33 }
 0x3af   :  { %3906 = vmatpush3.bf16.msra.mxu1 %v4077_v47 }
 0x432   :  { %v3697_v46 = vpop.f32.mrf.mxu1 }
 0x433   :  { %v3719_v1 = vpop.f32.mrf.mxu0 }
 0x434   :  { %v3698_v54 = vpop.f32.mrf.mxu1 }
 0x435   :  { %v3720_v55 = vpop.f32.mrf.mxu0  ;;  %v3699_v62 = vadd.f32 %v3698_v54, %v3697_v46  ;;  %v4079_v54 = vld [vmem:[%s5128_s15 + $0x38] sm:$0xff]  }
 0x436   :  { %v3700_v56 = vpop.f32.mrf.mxu1  ;;  %v3721_v63 = vadd.f32 %v3720_v55, %v3719_v1 }
 0x437   :  { %v3722_v24 = vpop.f32.mrf.mxu0  ;;  %v4080_v56 = vld [vmem:[%s5128_s15 + $0x30] sm:$0xff]  }
 0x438   :  { %v3701_v57 = vpop.f32.mrf.mxu1  ;;  %v2864_v44 = vadd.f32 %v3721_v63, %v3699_v62  ;;  %v4081_v24 = vld [vmem:[%s5128_s15 + $0x28] sm:$0xff]   ;;  %v4084_v62 = vld [vmem:[%s5128_s15 + $0x10] sm:$0xff]  }
 0x439   :  { %v3723_v61 = vpop.f32.mrf.mxu0  ;;  %v4082_v57 = vld [vmem:[%s5128_s15 + $0x20] sm:$0xff]   ;;  %v4085_v63 = vld [vmem:[%s5128_s15 + $0x8] sm:$0xff]  }
 0x43a   :  { %v4083_v61 = vld [vmem:[%s5128_s15 + $0x18] sm:$0xff]  }
 0x452   :  { %v2903_v0 = vpop.f32.mrf.mxu1 }
 0x453   :  { %v2904_v43 = vadd.f32 %v2903_v0, %v2864_v44  ;;  %v4086_v44 = vld [vmem:[%s5128_s15] sm:$0xff]  }
 0x454   :  { %v3869_v5 = vpop.f32.mrf.mxu1 }
 0x455   :  { %v2916_v7 = vmul.f32 %v3493_v45, %v2904_v43  ;;  %v3527_v43 = vld [vmem:[%s5127_s14] ss:$0 sm:$0xff]  ;;  %s4087_s14 = scalar_lea.vmem %s3332_s20, 32 }
 0x456   :  { %v2906_v50 = vpop.f32.mrf.mxu1  ;;  %p4088_p0 = scmp.ne.s32.totalorder %s3332_s20, %s4087_s14  ;;  %p4093_p2 = scmp.lt.s32.totalorder %s4087_s14, %s4087_s14 }
 0x457   :  { %v2924_v3 = vadd.f32 %v3494_v2, %v2916_v7 }
 0x458   :  { %v3870_v9 = vpop.f32.mrf.mxu1  ;;  %p4094_p3 = por %p4093_p2, %p4092_p1 }
 0x459   :  { %v2925_v53 = vmax.f32 %v2924_v3, 0.0 }
 0x45a   :  { %p4095_p4 = pnand %p4094_p3, %p4088_p0 }
 0x45b   :  { %v2927_v10 = vcombine.high %v2925_v53, %v2925_v53  ;;  %v2934_v28 = vrot.slane %v2925_v53, %v4481_v32 }
 0x45d   :  { %v2941_v8 = vrot.slane %v2927_v10, %v4481_v32  ;;  %v2942_v11 = vcombine.high %v2934_v28, %v2934_v28  ;;  %v2948_v12 = vsel %vm99_vm1, %v2934_v28, -inf }
 0x45e   :  { %v2949_v13 = vrot.slane %v2948_v12, 4 }
 0x45f   :  { %v2943_v14 = vcombine.high %v2941_v8, %v2941_v8  ;;  %v2955_v16 = vsel %vm99_vm1, %v2942_v11, -inf  ;;  %v2962_v42 = vsel %vm99_vm1, %v2941_v8, -inf  ;;  %v3528_v8 = vld [vmem:[%s5129_s16] ss:$0 sm:$0xff] }
 0x460   :  { %v2950_v17 = vmax.f32 %v2948_v12, %v2949_v13  ;;  %v2956_v18 = vrot.slane %v2955_v16, 4  ;;  %v2963_v19 = vrot.slane %v2962_v42, 4 }
 0x461   :  { %v2969_v20 = vsel %vm99_vm1, %v2943_v14, -inf }
 0x462   :  { %v2951_v6 = vrot.slane %v2950_v17, 2  ;;  %v2957_v21 = vmax.f32 %v2955_v16, %v2956_v18  ;;  %v2964_v23 = vmax.f32 %v2962_v42, %v2963_v19  ;;  %v2970_v59 = vrot.slane %v2969_v20, 4 }
 0x464   :  { %v2952_v25 = vmax.f32 %v2950_v17, %v2951_v6  ;;  %v2958_v32 = vrot.slane %v2957_v21, 2  ;;  %v2965_v51 = vrot.slane %v2964_v23, 2  ;;  %v2971_v26 = vmax.f32 %v2969_v20, %v2970_v59 }
 0x466   :  { %v2953_v29 = vrot.slane %v2952_v25, 1  ;;  %v2959_v30 = vmax.f32 %v2957_v21, %v2958_v32  ;;  %v2966_v34 = vmax.f32 %v2964_v23, %v2965_v51  ;;  %v2972_v35 = vrot.slane %v2971_v26, 2 }
 0x468   :  { %v2954_v27 = vmax.f32 %v2952_v25, %v2953_v29  ;;  %v2967_v36 = vrot.slane %v2966_v34, 1  ;;  %v2960_v31 = vrot.slane %v2959_v30, 1  ;;  %v2973_v22 = vmax.f32 %v2971_v26, %v2972_v35 }
 0x46a   :  { %v2968_v58 = vmax.f32 %v2966_v34, %v2967_v36  ;;  %v2976_v60 = vpack.c.bf16 %v2954_v27, %v2954_v27  ;;  %v2961_v37 = vmax.f32 %v2959_v30, %v2960_v31  ;;  %v2974_v52 = vrot.slane %v2973_v22, 1 }
 0x46c   :  { %v2977_v38 = vpack.c.bf16 %v2968_v58, %v2968_v58  ;;  %v2975_v4 = vmax.f32 %v2973_v22, %v2974_v52  ;;  %v2994_v48 = vpack.c.bf16 %v2961_v37, %v2961_v37  ;;  %v3110_v39 = vunpack.c.l.b16 %v2976_v60 }
 0x46e   :  { %v3111_v40 = vunpack.c.l.b16 %v2977_v38  ;;  %v2995_v41 = vpack.c.bf16 %v2975_v4, %v2975_v4  ;;  %v3015_v47 = vunpack.c.l.b16 %v2994_v48 }
 0x470   :  { %v3112_v15 = vsel %vm1028_vm3, %v3111_v40, %v3110_v39  ;;  %v3016_v49 = vunpack.c.l.b16 %v2995_v41 }
 0x471   :  { %v3113_v46 = vpack.c.b16 %v3112_v15, %v3112_v15 }
 0x472   :  { %v3017_v1 = vsel %vm1028_vm3, %v3016_v49, %v3015_v47 }
 0x473   :  { %3908 = vmatmul.mubr.bf16.vlgmr.msra.gmra.mxu1 %v3113_v46  ;;  %v3018_v55 = vpack.c.b16 %v3017_v1, %v3017_v1 }
 0x475   :  { %3888 = vmatmul.mubr.bf16.vlgmr.msra.gmra.mxu0 %v3018_v55 }
 0x476   :  { %3912 = vmatpush3.bf16.msra.mxu0 %v4079_v54  ;;  %3927 = vmatprep.mubr.msk.bf16.mxu0 %vm4112_vm10, %v4110_v33 }
 0x477   :  { %3913 = vmatprep.subr.bf16.mxu0 %v4110_v33 }
 0x47a   :  { %3914 = vmatpush3.bf16.msra.mxu0 %v4080_v56 }
 0x47b   :  { %3915 = vmatprep.subr.bf16.mxu0 %v4110_v33 }
 0x47e   :  { %3916 = vmatpush3.bf16.msra.mxu0 %v4081_v24 }
 0x47f   :  { %3917 = vmatprep.subr.bf16.mxu0 %v4110_v33 }
 0x482   :  { %3918 = vmatpush3.bf16.msra.mxu0 %v4082_v57 }
 0x483   :  { %3919 = vmatprep.subr.bf16.mxu0 %v4110_v33 }
 0x486   :  { %3920 = vmatpush3.bf16.msra.mxu0 %v4083_v61 }
 0x487   :  { %3921 = vmatprep.subr.bf16.mxu0 %v4110_v33 }
 0x48a   :  { %3922 = vmatpush3.bf16.msra.mxu0 %v4084_v62 }
 0x48b   :  { %3923 = vmatprep.subr.bf16.mxu0 %v4110_v33 }
 0x48e   :  { %3924 = vmatpush3.bf16.msra.mxu0 %v4085_v63 }
 0x48f   :  { %3925 = vmatprep.subr.bf16.mxu0 %v4110_v33 }
 0x492   :  { %3926 = vmatpush3.bf16.msra.mxu0 %v4086_v44 }
 0x533   :  { %v3197_v0 = vpop.f32.mrf.mxu1 }
 0x535   :  { %v3102_v45 = vpop.f32.mrf.mxu0  ;;  %v3909_v2 = vpop.f32.mrf.mxu1 }
 0x536   :  { %v3198_v5 = vadd.f32 %v3197_v0, %v3102_v45 }
 0x537   :  { %v3889_v7 = vpop.f32.mrf.mxu0  ;;  %v3200_v50 = vpop.f32.mrf.mxu1 }
 0x538   :  { %v3210_v3 = vadd.f32 %v3527_v43, %v3198_v5 }
 0x539   :  { %v3105_v9 = vpop.f32.mrf.mxu0  ;;  %v3910_v53 = vpop.f32.mrf.mxu1 }
 0x53a   :  { %v3211_v10 = vmax.f32 %v3210_v3, 0.0 }
 0x53b   :  { %v3890_v33 = vpop.f32.mrf.mxu0 }
 0x53c   :  { %v3212_v28 = vpack.c.bf16 %v3211_v10, %v3211_v10 }
 0x53e   :  { %3928 = vmatmul.mubr.bf16.vlgmr.msra.gmra.mxu0 %v3212_v28 }
 0x5fe   :  { %v3318_v11 = vpop.f32.mrf.mxu0 }
 0x5ff   :  { %v3319_v12 = vadd.f32 %v3528_v8, %v3318_v11 }
 0x600   :  { %v3929_v13 = vpop.f32.mrf.mxu0 }
 0x601   :  { %3324 = vst [vmem:[#allocation3] sm:$0x3] %v3319_v12 }
 0x602   :  { %v3321_v14 = vpop.f32.mrf.mxu0 }
 0x603   :  { %4098 = shalt.err (!%p4095_p4)
}
 0x604   :  { %3334 = dma.vmem_to_hbm [thread:$0]  %s3332_s20, 32, %s5130_s17, [#allocation4]   ;;  %v3930_v16 = vpop.f32.mrf.mxu0 }
 0x605   :  { %4107 = dma.done.wait [#allocation4], 32  }
 0x606   :  { %4108 = vsyncadd [#allocation4], 4294967264 }
 0x607   :  { %3338 = vsyncpa [#allocation4], 1 }

</bundles_post_ra>
